<compile_context>
chip_gen: v6e
topology: v6e:2x2x1
jax: 0.10.0
libtpu: 0.0.40
codegen_flags: <defaults>
</compile_context>

<pallas_src>
import functools

import jax
import jax.numpy as jnp
from jax import lax
from jax.experimental import pallas as pl
from jax.experimental.pallas import tpu as pltpu


# ------------------------------ tiling helpers ------------------------------

def _lane_tile(n, cap=2048):
    """Largest multiple-of-128 divisor of n that is <= cap (full n if none)."""
    best = None
    t = 128
    while t <= min(n, cap):
        if n % t == 0:
            best = t
        t += 128
    if best is None:
        # TODO(synk): pad HW up to a multiple of 128 (masked tail) instead of
        #             degrading to one full-width block.
        return n
    return best


def _row_tile(H, W, target=1024):
    """Smallest th dividing H with th*W a multiple of 128 and th*W >= target."""
    cand = [th for th in range(1, H + 1)
            if H % th == 0 and (th * W) % 128 == 0]
    if not cand:
        # TODO(synk): pad W to a lane-friendly size for odd resolutions.
        return H
    for th in cand:
        if th * W >= target:
            return th
    return cand[-1]


def _vmem_limit(block_bytes, scratch_bytes=0):
    """Per-kernel scoped-VMEM request: ~double-buffered blocks + scratch +
    slack, clamped to stay under v7x's 64 MiB physical VMEM."""
    est = 2 * int(block_bytes) + int(scratch_bytes) + (6 << 20)
    return int(min(max(est, 16 << 20), 48 << 20))


# ----------------------------------------------------------------------------
# Fused 1x1 conv (channel matmul) + depthwise 3x3 conv (padding=1, groups=3C),
# row-tiled with a 1-row halo.  x arrives flattened and zero-padded by one
# image row on each end of the spatial axis; each grid step slices a
# (th+2)-row window, runs the pointwise matmul, does the 9-tap dwconv with
# 4 lane rolls + 2 column masks, and writes th rows of (3C, HW).
# ----------------------------------------------------------------------------
def _qkv_dw_kernel(x_ref, wq_ref, bq_ref, wd_ref, bd_ref, o_ref, *, H, W, th):
    HW = H * W
    tlen = th * W                 # output lanes per tile
    ext = tlen + 2 * W            # window = tile + 1 halo row on each side
    nt = H // th

    r = pl.program_id(1)
    start = r * tlen if nt > 1 else 0        # 128-aligned when nt > 1

    # pointwise 1x1 conv on the halo window (f32 accumulation on the MXU).
    xw = x_ref[0, :, pl.ds(start, ext)]                        # (C, ext)
    qkv = jnp.dot(wq_ref[...], xw, preferred_element_type=jnp.float32)
    qkv = qkv + bq_ref[...].astype(jnp.float32)

    # zero the out-of-image halo rows (dwconv's zero padding): padded flat
    # index < W is image row -1, >= W + HW is image row H.
    gidx = start + lax.broadcasted_iota(jnp.int32, (1, ext), 1)
    qkv = jnp.where((gidx >= W) & (gidx < W + HW), qkv, 0.0)

    # bf16 tap slabs on bf16 models (v6e/v7x bf16 VALU); accumulation stays f32.
    tap_dtype = jnp.bfloat16 if o_ref.dtype == jnp.bfloat16 else jnp.float32
    c0 = qkv.astype(tap_dtype)

    # stage 1: the three column-shifted copies (2 lane rolls + 2 column masks).
    col = gidx % W
    c_m1 = jnp.where(col >= 1, pltpu.roll(c0, 1, axis=1), 0)
    c_p1 = jnp.where(col <= W - 2, pltpu.roll(c0, ext - 1, axis=1), 0)

    # stage 2: per-kernel-row weighted partials (pure VPU FMAs, no rolls).
    wd = wd_ref[...].astype(jnp.float32)                       # (3C, 9)

    def row_partial(di):
        t0 = (di + 1) * 3
        return (c_m1 * wd[:, t0:t0 + 1]
                + c0 * wd[:, t0 + 1:t0 + 2]
                + c_p1 * wd[:, t0 + 2:t0 + 3])                 # f32 (3C, ext)

    p_up, p_mid, p_dn = row_partial(-1), row_partial(0), row_partial(1)

    # stage 3: two row rolls (multiples of W), aligned so the th output rows
    # land at lane offset 0; halo rows fall off the [:, :tlen] slice.
    y = (p_up[:, :tlen]
         + pltpu.roll(p_mid, ext - W, axis=1)[:, :tlen]
         + pltpu.roll(p_dn, ext - 2 * W, axis=1)[:, :tlen])
    y = y + bd_ref[...].astype(jnp.float32)
    o_ref[0] = y.astype(o_ref.dtype)


def qkv_dwconv(x, w_qkv, b_qkv, w_dw, b_dw):
    B, C, H, W = x.shape
    HW = H * W
    C3 = w_qkv.shape[0]
    th = _row_tile(H, W)
    tlen = th * W
    nt = H // th
    HWp = HW + 2 * W

    # one zero image-row of padding on each end of the flattened spatial axis
    # (tiny host-side pad; realizes the dwconv's padding=1 zeros).
    x_pad = jnp.pad(x.reshape(B, C, HW), ((0, 0), (0, 0), (W, W)))

    kern = functools.partial(_qkv_dw_kernel, H=H, W=W, th=th)
    itemsize = x.dtype.itemsize
    block_bytes = (C * HWp + C3 * tlen) * itemsize + C3 * C * itemsize
    scratch_bytes = 8 * C3 * (tlen + 2 * W) * 4     # in-kernel f32 temporaries
    return pl.pallas_call(
        kern,
        out_shape=jax.ShapeDtypeStruct((B, C3, HW), x.dtype),
        grid=(B, nt),
        in_specs=[
            pl.BlockSpec((1, C, HWp), lambda b, r: (b, 0, 0)),  # resident / batch
            pl.BlockSpec((C3, C), lambda b, r: (0, 0)),
            pl.BlockSpec((C3, 1), lambda b, r: (0, 0)),
            pl.BlockSpec((C3, 9), lambda b, r: (0, 0)),
            pl.BlockSpec((C3, 1), lambda b, r: (0, 0)),
        ],
        out_specs=pl.BlockSpec((1, C3, tlen), lambda b, r: (b, 0, r)),
        compiler_params=pltpu.CompilerParams(
            dimension_semantics=("parallel", "parallel"),
            vmem_limit_bytes=_vmem_limit(block_bytes, scratch_bytes)),
    )(x_pad, w_qkv, b_qkv.reshape(C3, 1), w_dw.reshape(C3, 9),
      b_dw.reshape(C3, 1))


# ----------------------------------------------------------------------------
# Channel attention pass 1: stream q/k tiles over HW, accumulate the Cd x Cd
# gram + squared L2 norms; at the last tile fold L2 normalization, temperature,
# softmax and the per-head column block of project_out's weight into
# M_h = W_proj_h @ softmax(attn_h)   (a (C, Cd) matrix per head).
# ----------------------------------------------------------------------------
def _attn_fold_kernel(temp_ref, qk_ref, wp_ref, m_ref,
                      gram_ref, qss_ref, kss_ref):
    h = pl.program_id(1)
    t = pl.program_id(2)
    last = pl.num_programs(2) - 1
    temp = temp_ref[h]                           # scalar read from SMEM

    q = qk_ref[0, 0, 0]                          # (Cd, thw), native dtype
    k = qk_ref[0, 1, 0]

    @pl.when(t == 0)
    def _():
        gram_ref[...] = jnp.zeros_like(gram_ref)
        qss_ref[...] = jnp.zeros_like(qss_ref)
        kss_ref[...] = jnp.zeros_like(kss_ref)

    # unnormalized gram: contract the HW (lane) axis, no explicit transpose.
    gram_ref[...] += lax.dot_general(
        q, k, (((1,), (1,)), ((), ())), preferred_element_type=jnp.float32)

    qf = q.astype(jnp.float32)
    kf = k.astype(jnp.float32)
    qss_ref[...] += jnp.sum(qf * qf, axis=-1, keepdims=True)          # (Cd, 1)
    kss_ref[...] += lax.dot_general(                                   # (1, Cd)
        jnp.ones((1, kf.shape[-1]), jnp.float32), kf * kf,
        (((1,), (1,)), ((), ())), preferred_element_type=jnp.float32)

    @pl.when(t == last)
    def _():
        qn = jnp.maximum(jnp.sqrt(qss_ref[...]), 1e-12)        # (Cd, 1)
        kn = jnp.maximum(jnp.sqrt(kss_ref[...]), 1e-12)        # (1, Cd)
        attn = gram_ref[...] * (temp / (qn * kn))              # folded L2 norm
        attn = attn - jnp.max(attn, axis=-1, keepdims=True)
        e = jnp.exp(attn)
        p = e / jnp.sum(e, axis=-1, keepdims=True)             # (Cd, Cd) f32
        m = jnp.dot(wp_ref[0].astype(jnp.float32), p,
                    preferred_element_type=jnp.float32)        # (C, Cd)
        m_ref[0, 0] = m


# ----------------------------------------------------------------------------
# Pass 2 (attention apply fused with project_out):
#   out_tile = sum_h M_h @ v_h_tile + b_proj, streamed over HW tiles.
# ----------------------------------------------------------------------------
def _apply_proj_kernel(m_ref, v_ref, b_ref, o_ref):
    Hn = m_ref.shape[1]
    C = m_ref.shape[2]
    thw = o_ref.shape[2]
    acc = jnp.zeros((C, thw), jnp.float32)
    for h in range(Hn):                          # static, unrolled head loop
        acc = acc + jnp.dot(m_ref[0, h], v_ref[0, 0, h],
                            preferred_element_type=jnp.float32)
    acc = acc + b_ref[...].astype(jnp.float32)
    o_ref[0] = acc.astype(o_ref.dtype)


def channel_attention_project(qkv, w_proj, b_proj, temperature, num_heads):
    B, C3, HW = qkv.shape
    C = C3 // 3
    assert C % num_heads == 0, "dim must be divisible by num_heads"
    Hn = num_heads
    Cd = C // Hn
    thw = _lane_tile(HW)
    nt = HW // thw
    itemsize = qkv.dtype.itemsize

    qkv5 = qkv.reshape(B, 3, Hn, Cd, HW)          # metadata-only reshape
    # per-head column blocks of the project_out weight: (Hn, C, Cd)
    wp_heads = w_proj.reshape(C, Hn, Cd).transpose(1, 0, 2)
    temp = temperature.reshape(Hn).astype(jnp.float32)

    p1_blocks = 2 * Cd * thw * itemsize + C * Cd * (itemsize + 4)
    m = pl.pallas_call(
        _attn_fold_kernel,
        out_shape=jax.ShapeDtypeStruct((B, Hn, C, Cd), jnp.float32),
        grid=(B, Hn, nt),
        in_specs=[
            pl.BlockSpec(memory_space=pltpu.MemorySpace.SMEM),    # temperature
            pl.BlockSpec((1, 2, 1, Cd, thw),                      # q and k
                         lambda b, h, t: (b, 0, h, 0, t)),
            pl.BlockSpec((1, C, Cd), lambda b, h, t: (h, 0, 0)),  # W_proj_h
        ],
        out_specs=pl.BlockSpec((1, 1, C, Cd), lambda b, h, t: (b, h, 0, 0)),
        scratch_shapes=[
            pltpu.VMEM((Cd, Cd), jnp.float32),
            pltpu.VMEM((Cd, 1), jnp.float32),
            pltpu.VMEM((1, Cd), jnp.float32),
        ],
        compiler_params=pltpu.CompilerParams(
            dimension_semantics=("parallel", "parallel", "arbitrary"),
            vmem_limit_bytes=_vmem_limit(p1_blocks, 4 * Cd * (Cd + 2) * 4)),
    )(temp, qkv5, wp_heads)

    p2_blocks = (Hn * C * Cd * 4 + Hn * Cd * thw * itemsize
                 + C * thw * itemsize + C * itemsize)
    out = pl.pallas_call(
        _apply_proj_kernel,
        out_shape=jax.ShapeDtypeStruct((B, C, HW), qkv.dtype),
        grid=(B, nt),
        in_specs=[
            pl.BlockSpec((1, Hn, C, Cd), lambda b, t: (b, 0, 0, 0)),    # M
            pl.BlockSpec((1, 1, Hn, Cd, thw), lambda b, t: (b, 2, 0, 0, t)),  # v
            pl.BlockSpec((C, 1), lambda b, t: (0, 0)),                  # bias
        ],
        out_specs=pl.BlockSpec((1, C, thw), lambda b, t: (b, 0, t)),
        compiler_params=pltpu.CompilerParams(
            dimension_semantics=("parallel", "parallel"),
            vmem_limit_bytes=_vmem_limit(p2_blocks, C * thw * 4)),
    )(m, qkv5, b_proj.reshape(C, 1))
    return out


# ----------------------------------------------------------------------------
# Full CAttention forward.
# ----------------------------------------------------------------------------
def cattention_forward(x, params, num_heads):
    B, C, H, W = x.shape
    qkv = qkv_dwconv(x, params["w_qkv"], params["b_qkv"],
                     params["w_dw"], params["b_dw"])                 # (B,3C,HW)
    out = channel_attention_project(qkv, params["w_proj"], params["b_proj"],
                                    params["temperature"], num_heads)
    return out.reshape(B, C, H, W)


# ----------------------------------------------------------------------------
# Pure-JAX reference (mirrors the PyTorch forward) for verification.
# ----------------------------------------------------------------------------
def reference_forward(x, params, num_heads):
    B, C, H, W = x.shape
    dn = ("NCHW", "OIHW", "NCHW")
    hp = lax.Precision.HIGHEST
    qkv = lax.conv_general_dilated(x, params["w_qkv"][:, :, None, None],
                                   (1, 1), "VALID", dimension_numbers=dn,
                                   precision=hp)
    qkv = qkv + params["b_qkv"][None, :, None, None]
    qkv = lax.conv_general_dilated(qkv, params["w_dw"][:, None, :, :],
                                   (1, 1), "SAME", dimension_numbers=dn,
                                   feature_group_count=3 * C, precision=hp)
    qkv = qkv + params["b_dw"][None, :, None, None]
    q, k, v = jnp.split(qkv, 3, axis=1)

    def rearr(t):
        return t.reshape(B, num_heads, C // num_heads, H * W)

    q, k, v = rearr(q), rearr(k), rearr(v)
    qn = q / jnp.maximum(jnp.linalg.norm(q, axis=-1, keepdims=True), 1e-12)
    kn = k / jnp.maximum(jnp.linalg.norm(k, axis=-1, keepdims=True), 1e-12)
    attn = jnp.einsum("bhcd,bhed->bhce", qn, kn, precision=hp)
    attn = attn * params["temperature"][None]
    attn = jax.nn.softmax(attn, axis=-1)
    out = jnp.einsum("bhce,bhed->bhcd", attn, v, precision=hp)
    out = out.reshape(B, C, H, W)
    out = lax.conv_general_dilated(out, params["w_proj"][:, :, None, None],
                                   (1, 1), "VALID", dimension_numbers=dn,
                                   precision=hp)
    return out + params["b_proj"][None, :, None, None]


if __name__ == "__main__":
    dim, num_heads, B, H, W = 8, 2, 2, 64, 64     # bias=True

    key = jax.random.PRNGKey(0)
    ks = jax.random.split(key, 8)
    x = jax.random.normal(ks[0], (B, dim, H, W), jnp.float32)
    params = {
        "w_qkv": jax.random.normal(ks[1], (3 * dim, dim), jnp.float32) * 0.1,
        "b_qkv": jax.random.normal(ks[2], (3 * dim,), jnp.float32) * 0.01,
        "w_dw": jax.random.normal(ks[3], (3 * dim, 3, 3), jnp.float32) * 0.1,
        "b_dw": jax.random.normal(ks[4], (3 * dim,), jnp.float32) * 0.01,
        "w_proj": jax.random.normal(ks[5], (dim, dim), jnp.float32) * 0.1,
        "b_proj": jax.random.normal(ks[6], (dim,), jnp.float32) * 0.01,
        # nn.Parameter(torch.ones(...)) at init; perturbed here to exercise the
        # per-head temperature path.
        "temperature": 0.5 + jax.random.uniform(ks[7], (num_heads, 1, 1),
                                                jnp.float32),
    }

    out = jax.block_until_ready(cattention_forward(x, params, num_heads))
    assert out.shape == (B, dim, H, W)
    ref = reference_forward(x, params, num_heads)
    err = float(jnp.max(jnp.abs(out - ref)))
    assert err < 2e-3, f"max abs err {err}"
    print("KERNEL_OK")
</pallas_src>

<mosaic_0001>
module attributes {stable_mosaic.version = 11 : i64} {
  func.func @_qkv_dw_kernel(%arg0: i32, %arg1: i32, %arg2: memref<1x8x4224xf32, #tpu.memory_space<vmem>>, %arg3: memref<24x8xf32, #tpu.memory_space<vmem>>, %arg4: memref<24x1xf32, #tpu.memory_space<vmem>>, %arg5: memref<24x9xf32, #tpu.memory_space<vmem>>, %arg6: memref<24x1xf32, #tpu.memory_space<vmem>>, %arg7: memref<1x24x1024xf32, #tpu.memory_space<vmem>>) attributes {dimension_semantics = [#tpu.dimension_semantics<parallel>, #tpu.dimension_semantics<parallel>], iteration_bounds = array<i64: 2, 4>, scalar_prefetch = 0 : i64, scratch_operands = 0 : i64, tpu.core_type = #tpu.core_type<tc>, window_params = [{transform_indices = @transform_0, window_bounds = array<i64: 1, 8, 4224>}, {pipeline_mode = #tpu.pipeline_mode<synchronous>, transform_indices = @transform_1, window_bounds = array<i64: 24, 8>}, {pipeline_mode = #tpu.pipeline_mode<synchronous>, transform_indices = @transform_2, window_bounds = array<i64: 24, 1>}, {pipeline_mode = #tpu.pipeline_mode<synchronous>, transform_indices = @transform_3, window_bounds = array<i64: 24, 9>}, {pipeline_mode = #tpu.pipeline_mode<synchronous>, transform_indices = @transform_4, window_bounds = array<i64: 24, 1>}, {transform_indices = @transform_5, window_bounds = array<i64: 1, 24, 1024>}]} {
    %c1024_i32 = arith.constant 1024 : i32
    %0 = arith.muli %arg1, %c1024_i32 : i32
    %c0 = arith.constant 0 : index
    %c0_0 = arith.constant 0 : index
    %1 = arith.index_cast %0 : i32 to index
    %2 = vector.load %arg2[%c0, %c0_0, %1] : memref<1x8x4224xf32, #tpu.memory_space<vmem>>, vector<1x8x1152xf32>
    %3 = vector.shape_cast %2 : vector<1x8x1152xf32> to vector<8x1152xf32>
    %c0_1 = arith.constant 0 : index
    %c0_2 = arith.constant 0 : index
    %4 = vector.load %arg3[%c0_1, %c0_2] : memref<24x8xf32, #tpu.memory_space<vmem>>, vector<24x8xf32>
    %cst = arith.constant dense<0.000000e+00> : vector<24x1152xf32>
    %5 = tpu.matmul %4, %3, %cst {dimension_numbers = #tpu.dot_dimension_numbers<[1], [0], [0], [1], [0, 0, 1, 1], [], []>} : vector<24x8xf32>, vector<8x1152xf32>, vector<24x1152xf32> -> vector<24x1152xf32>
    %c0_3 = arith.constant 0 : index
    %c0_4 = arith.constant 0 : index
    %6 = vector.load %arg4[%c0_3, %c0_4] : memref<24x1xf32, #tpu.memory_space<vmem>>, vector<24x1xf32>
    %7 = vector.broadcast %6 : vector<24x1xf32> to vector<24x1152xf32>
    %8 = arith.addf %5, %7 : vector<24x1152xf32>
    %9 = tpu.iota {dimensions = array<i32: 1>} : vector<1x1152xi32>
    %10 = vector.broadcast %0 : i32 to vector<1x1152xi32>
    %11 = arith.addi %10, %9 : vector<1x1152xi32>
    %c64_i32 = arith.constant 64 : i32
    %12 = vector.broadcast %c64_i32 : i32 to vector<1x1152xi32>
    %13 = arith.cmpi sge, %11, %12 : vector<1x1152xi32>
    %c4160_i32 = arith.constant 4160 : i32
    %14 = vector.broadcast %c4160_i32 : i32 to vector<1x1152xi32>
    %15 = arith.cmpi slt, %11, %14 : vector<1x1152xi32>
    %16 = arith.andi %13, %15 : vector<1x1152xi1>
    %cst_5 = arith.constant 0.000000e+00 : f32
    %17 = vector.shape_cast %16 : vector<1x1152xi1> to vector<1x1152xi1>
    %18 = vector.broadcast %17 : vector<1x1152xi1> to vector<24x1152xi1>
    %19 = vector.broadcast %cst_5 : f32 to vector<24x1152xf32>
    %20 = arith.select %18, %8, %19 : vector<24x1152xi1>, vector<24x1152xf32>
    %c64_i32_6 = arith.constant 64 : i32
    %c0_i32 = arith.constant 0 : i32
    %21 = arith.cmpi eq, %c64_i32_6, %c0_i32 : i32
    %c1_i32 = arith.constant 1 : i32
    %22 = arith.select %21, %c1_i32, %c64_i32_6 : i32
    %23 = vector.broadcast %22 : i32 to vector<1x1152xi32>
    %24 = arith.remsi %11, %23 : vector<1x1152xi32>
    %c0_i32_7 = arith.constant 0 : i32
    %25 = vector.broadcast %c0_i32_7 : i32 to vector<1x1152xi32>
    %26 = arith.cmpi ne, %24, %25 : vector<1x1152xi32>
    %c0_i32_8 = arith.constant 0 : i32
    %27 = vector.broadcast %c0_i32_8 : i32 to vector<1x1152xi32>
    %28 = arith.cmpi slt, %24, %27 : vector<1x1152xi32>
    %c0_i32_9 = arith.constant 0 : i32
    %29 = arith.cmpi slt, %22, %c0_i32_9 : i32
    %30 = vector.broadcast %29 : i1 to vector<1x1152xi1>
    %31 = vector.broadcast %30 : vector<1x1152xi1> to vector<1x1152xi1>
    %32 = arith.xori %28, %31 : vector<1x1152xi1>
    %33 = arith.andi %32, %26 : vector<1x1152xi1>
    %34 = vector.broadcast %22 : i32 to vector<1x1152xi32>
    %35 = arith.addi %24, %34 : vector<1x1152xi32>
    %36 = arith.select %33, %35, %24 : vector<1x1152xi1>, vector<1x1152xi32>
    %c1_i32_10 = arith.constant 1 : i32
    %37 = vector.broadcast %c1_i32_10 : i32 to vector<1x1152xi32>
    %38 = arith.cmpi sge, %36, %37 : vector<1x1152xi32>
    %c1_i32_11 = arith.constant 1 : i32
    %39 = tpu.dynamic_rotate %20 by %c1_i32_11 dim 1 : vector<24x1152xf32>, i32 -> vector<24x1152xf32>
    %c0_i32_12 = arith.constant 0 : i32
    %40 = arith.sitofp %c0_i32_12 : i32 to f32
    %41 = vector.shape_cast %38 : vector<1x1152xi1> to vector<1x1152xi1>
    %42 = vector.broadcast %41 : vector<1x1152xi1> to vector<24x1152xi1>
    %43 = vector.broadcast %40 : f32 to vector<24x1152xf32>
    %44 = arith.select %42, %39, %43 : vector<24x1152xi1>, vector<24x1152xf32>
    %c62_i32 = arith.constant 62 : i32
    %45 = vector.broadcast %c62_i32 : i32 to vector<1x1152xi32>
    %46 = arith.cmpi sle, %36, %45 : vector<1x1152xi32>
    %c1151_i32 = arith.constant 1151 : i32
    %47 = tpu.dynamic_rotate %20 by %c1151_i32 dim 1 : vector<24x1152xf32>, i32 -> vector<24x1152xf32>
    %c0_i32_13 = arith.constant 0 : i32
    %48 = arith.sitofp %c0_i32_13 : i32 to f32
    %49 = vector.shape_cast %46 : vector<1x1152xi1> to vector<1x1152xi1>
    %50 = vector.broadcast %49 : vector<1x1152xi1> to vector<24x1152xi1>
    %51 = vector.broadcast %48 : f32 to vector<24x1152xf32>
    %52 = arith.select %50, %47, %51 : vector<24x1152xi1>, vector<24x1152xf32>
    %c0_14 = arith.constant 0 : index
    %c0_15 = arith.constant 0 : index
    %53 = vector.load %arg5[%c0_14, %c0_15] : memref<24x9xf32, #tpu.memory_space<vmem>>, vector<24x9xf32>
    %54 = vector.extract_strided_slice %53 {offsets = [0, 0], sizes = [24, 1], strides = [1, 1]} : vector<24x9xf32> to vector<24x1xf32>
    %55 = vector.broadcast %54 : vector<24x1xf32> to vector<24x1152xf32>
    %56 = arith.mulf %44, %55 : vector<24x1152xf32>
    %57 = vector.extract_strided_slice %53 {offsets = [0, 1], sizes = [24, 1], strides = [1, 1]} : vector<24x9xf32> to vector<24x1xf32>
    %58 = vector.broadcast %57 : vector<24x1xf32> to vector<24x1152xf32>
    %59 = arith.mulf %20, %58 : vector<24x1152xf32>
    %60 = arith.addf %56, %59 : vector<24x1152xf32>
    %61 = vector.extract_strided_slice %53 {offsets = [0, 2], sizes = [24, 1], strides = [1, 1]} : vector<24x9xf32> to vector<24x1xf32>
    %62 = vector.broadcast %61 : vector<24x1xf32> to vector<24x1152xf32>
    %63 = arith.mulf %52, %62 : vector<24x1152xf32>
    %64 = arith.addf %60, %63 : vector<24x1152xf32>
    %65 = vector.extract_strided_slice %53 {offsets = [0, 3], sizes = [24, 1], strides = [1, 1]} : vector<24x9xf32> to vector<24x1xf32>
    %66 = vector.broadcast %65 : vector<24x1xf32> to vector<24x1152xf32>
    %67 = arith.mulf %44, %66 : vector<24x1152xf32>
    %68 = vector.extract_strided_slice %53 {offsets = [0, 4], sizes = [24, 1], strides = [1, 1]} : vector<24x9xf32> to vector<24x1xf32>
    %69 = vector.broadcast %68 : vector<24x1xf32> to vector<24x1152xf32>
    %70 = arith.mulf %20, %69 : vector<24x1152xf32>
    %71 = arith.addf %67, %70 : vector<24x1152xf32>
    %72 = vector.extract_strided_slice %53 {offsets = [0, 5], sizes = [24, 1], strides = [1, 1]} : vector<24x9xf32> to vector<24x1xf32>
    %73 = vector.broadcast %72 : vector<24x1xf32> to vector<24x1152xf32>
    %74 = arith.mulf %52, %73 : vector<24x1152xf32>
    %75 = arith.addf %71, %74 : vector<24x1152xf32>
    %76 = vector.extract_strided_slice %53 {offsets = [0, 6], sizes = [24, 1], strides = [1, 1]} : vector<24x9xf32> to vector<24x1xf32>
    %77 = vector.broadcast %76 : vector<24x1xf32> to vector<24x1152xf32>
    %78 = arith.mulf %44, %77 : vector<24x1152xf32>
    %79 = vector.extract_strided_slice %53 {offsets = [0, 7], sizes = [24, 1], strides = [1, 1]} : vector<24x9xf32> to vector<24x1xf32>
    %80 = vector.broadcast %79 : vector<24x1xf32> to vector<24x1152xf32>
    %81 = arith.mulf %20, %80 : vector<24x1152xf32>
    %82 = arith.addf %78, %81 : vector<24x1152xf32>
    %83 = vector.extract_strided_slice %53 {offsets = [0, 8], sizes = [24, 1], strides = [1, 1]} : vector<24x9xf32> to vector<24x1xf32>
    %84 = vector.broadcast %83 : vector<24x1xf32> to vector<24x1152xf32>
    %85 = arith.mulf %52, %84 : vector<24x1152xf32>
    %86 = arith.addf %82, %85 : vector<24x1152xf32>
    %87 = vector.extract_strided_slice %64 {offsets = [0, 0], sizes = [24, 1024], strides = [1, 1]} : vector<24x1152xf32> to vector<24x1024xf32>
    %c1088_i32 = arith.constant 1088 : i32
    %88 = tpu.dynamic_rotate %75 by %c1088_i32 dim 1 : vector<24x1152xf32>, i32 -> vector<24x1152xf32>
    %89 = vector.extract_strided_slice %88 {offsets = [0, 0], sizes = [24, 1024], strides = [1, 1]} : vector<24x1152xf32> to vector<24x1024xf32>
    %90 = arith.addf %87, %89 : vector<24x1024xf32>
    %c1024_i32_16 = arith.constant 1024 : i32
    %91 = tpu.dynamic_rotate %86 by %c1024_i32_16 dim 1 : vector<24x1152xf32>, i32 -> vector<24x1152xf32>
    %92 = vector.extract_strided_slice %91 {offsets = [0, 0], sizes = [24, 1024], strides = [1, 1]} : vector<24x1152xf32> to vector<24x1024xf32>
    %93 = arith.addf %90, %92 : vector<24x1024xf32>
    %c0_17 = arith.constant 0 : index
    %c0_18 = arith.constant 0 : index
    %94 = vector.load %arg6[%c0_17, %c0_18] : memref<24x1xf32, #tpu.memory_space<vmem>>, vector<24x1xf32>
    %95 = vector.broadcast %94 : vector<24x1xf32> to vector<24x1024xf32>
    %96 = arith.addf %93, %95 : vector<24x1024xf32>
    %c0_19 = arith.constant 0 : index
    %c0_20 = arith.constant 0 : index
    %c0_21 = arith.constant 0 : index
    %97 = vector.load %arg7[%c0_19, %c0_20, %c0_21] : memref<1x24x1024xf32, #tpu.memory_space<vmem>>, vector<1x24x1024xf32>
    %98 = vector.shape_cast %97 : vector<1x24x1024xf32> to vector<24x1024xf32>
    %99 = vector.shape_cast %96 : vector<24x1024xf32> to vector<1x24x1024xf32>
    tpu.vector_store %arg7[%c0_19, %c0_20, %c0_21], %99 {strides = array<i32>} : memref<1x24x1024xf32, #tpu.memory_space<vmem>>, vector<1x24x1024xf32>,
    return
  }
  func.func @transform_0(%arg0: i32, %arg1: i32) -> (i32, i32, i32) {
    %c0_i32 = arith.constant 0 : i32
    %c0_i32_0 = arith.constant 0 : i32
    %c0_i32_1 = arith.constant 0 : i32
    return %arg0, %c0_i32, %c0_i32_0 : i32, i32, i32
  }
  func.func @transform_1(%arg0: i32, %arg1: i32) -> (i32, i32) {
    %c0_i32 = arith.constant 0 : i32
    %c0_i32_0 = arith.constant 0 : i32
    %c0_i32_1 = arith.constant 0 : i32
    return %c0_i32, %c0_i32_0 : i32, i32
  }
  func.func @transform_2(%arg0: i32, %arg1: i32) -> (i32, i32) {
    %c0_i32 = arith.constant 0 : i32
    %c0_i32_0 = arith.constant 0 : i32
    %c0_i32_1 = arith.constant 0 : i32
    return %c0_i32, %c0_i32_0 : i32, i32
  }
  func.func @transform_3(%arg0: i32, %arg1: i32) -> (i32, i32) {
    %c0_i32 = arith.constant 0 : i32
    %c0_i32_0 = arith.constant 0 : i32
    %c0_i32_1 = arith.constant 0 : i32
    return %c0_i32, %c0_i32_0 : i32, i32
  }
  func.func @transform_4(%arg0: i32, %arg1: i32) -> (i32, i32) {
    %c0_i32 = arith.constant 0 : i32
    %c0_i32_0 = arith.constant 0 : i32
    %c0_i32_1 = arith.constant 0 : i32
    return %c0_i32, %c0_i32_0 : i32, i32
  }
  func.func @transform_5(%arg0: i32, %arg1: i32) -> (i32, i32, i32) {
    %c0_i32 = arith.constant 0 : i32
    %c0_i32_0 = arith.constant 0 : i32
    return %arg0, %c0_i32, %arg1 : i32, i32, i32
  }
}

</mosaic_0001>

<bundles_post_ra>
// kernel: tpu_custom_call.1
= control target key start
LH: loop header
LB: loop body
LE: loop exit
PB: predicated region body
PF: predicated region fallthrough
CT: control target
= control target key end

     0   :  { %10 = vsyncpa [#allocation3], 0  ;;  %s4641_s0 = inlined_call_operand.hbm [shape: f32[2,8,4224], index: 0, kind: input, shape index: {}]   ;;  %s4642_s1 = inlined_call_operand.vmem [shape: f32[24,8], index: 1, kind: input, shape index: {}]   ;;  %s4643_s2 = inlined_call_operand.vmem [shape: f32[24,1], index: 2, kind: input, shape index: {}]   ;;  %s4644_s3 = inlined_call_operand.vmem [shape: f32[24,9], index: 3, kind: input, shape index: {}]   ;;  %s4645_s4 = inlined_call_operand.vmem [shape: f32[24,1], index: 4, kind: input, shape index: {}]   ;;  %s4646_s5 = inlined_call_operand.hbm [shape: f32[2,24,4096], index: 5, kind: output, shape index: {}]  }
   0x1   :  { %12 = vsyncpa [#allocation3 + $0x1], 0 }
   0x2   :  { %13 = vsyncpa [#allocation4], 0 }
   0x3   :  { %15 = vsyncpa [#allocation4 + $0x1], 0  ;;  %s2366_s18 = smov 0   ;;  %s2368_s19 = smov 0  }
   0x4   :  { %s2370_s20 = smov 0   ;;  %s2372_s21 = smov 0  }
   0x5   :  { %s2374_s22 = smov 0   ;;  %s2376_s23 = smov 0  }
   0x6   :  { %s2378_s24 = smov 0   ;;  %s2380_s25 = smov 0  }
   0x7   :  { %s2382_s26 = smov 0   ;;  %s2384_s27 = smov 0  }
   0x8   :  { %s2386_s28 = smov 0  }
   0x9 LB: > { %4708 = sst [smem:[#allocation8_spill]] %s2296_s23  ;;  %s1972_s29 = sadd.s32 4294967295, %s2316_s28   ;;  %s2316_s28 = sphi %s2386_s28, %s21_s28   ;;  %s2312_s27 = sphi %s2384_s27, %s5022_s27   ;;  %s2308_s26 = sphi %s2382_s26, %s5021_s26   ;;  %s2304_s25 = sphi %s2380_s25, %s5020_s25   ;;  %s2300_s24 = sphi %s2378_s24, %s5019_s24   ;;  %s2296_s23 = sphi %s2376_s23, %s5018_s23   ;;  %s2292_s22 = sphi %s2374_s22, %s5027_s22   ;;  %s2288_s21 = sphi %s2372_s21, %s5026_s21   ;;  %s2284_s20 = sphi %s2370_s20, %s5025_s20   ;;  %s2280_s19 = sphi %s2368_s19, %s5024_s19   ;;  %s2276_s18 = sphi %s2366_s18, %s5023_s18  }
   0xa   : > { %4709 = sst [smem:[#allocation9_spill]] %s2308_s26  ;;  %s1973_s30 = sadd.s32 4294967294, %s2316_s28  }
   0xb   : > { %4710 = sst [smem:[#allocation10_spill]] %s2312_s27  ;;  %s30_s6 = sadd.s32 1, %s2308_s26 }
   0xc   : > { %s33_s7 = sadd.s32 1, %s2312_s27  ;;  %p31_p0 = scmp.ge.s32.totalorder %s30_s6, 4 }
   0xd   : > { %s40_s8 = sadd.s32 1, %s2296_s23  ;;  %p47_p1 = scmp.ne.s32.totalorder %s2296_s23, %s2292_s22 }
   0xe   : > { %p48_p2 = scmp.eq.s32.totalorder %s2316_s28, 0  ;;  %s5029_s6 = smov (%p31_p0, %s30_s6), 0 }
   0xf   : > { %4711 = sst [smem:[#allocation11_spill]] %s5029_s6  ;;  %s5031_s7 = smov (!%p31_p0, %s33_s7), %s2312_s27 }
  0x10   : > { %p2430_p3 = por %p48_p2, %p47_p1  ;;  %p53_p4 = scmp.ne.s32.totalorder %s2292_s22, %s2288_s21 }
  0x11   : > { %p35_p5 = scmp.ge.s32.totalorder %s5031_s7, 2  ;;  %p54_p6 = scmp.eq.s32.totalorder %s1972_s29, 0 }
  0x12   : > { %s148_s10 = ssub.s32 %s2308_s26, %s5029_s6  ;;  %s152_s11 = sadd.s32 1, %s2284_s20 }
  0x13   : > { %s5033_s7 = smov (%p35_p5, %s5031_s7), 0  ;;  %p2440_p7 = por %p54_p6, %p53_p4 }
  0x14   : > { %4713 = sst [smem:[#allocation12_spill]] %s5033_s7  ;;  %p162_p8 = scmp.ne.s32.totalorder %s2284_s20, %s2280_s19 }
  0x15   : > { %s37_s13 = ssub.s32 %s2312_s27, %s5033_s7  ;;  %p163_p9 = scmp.eq.s32.totalorder %s1972_s29, 7 }
  0x16   : > { %p38_p10 = scmp.eq.s32.totalorder %s37_s13, 0  ;;  %s149_s14 = sor.u32 %s148_s10, %s37_s13 }
  0x17   : > { %p150_p11 = scmp.eq.s32.totalorder %s149_s14, 0  ;;  %p2448_p12 = por %p163_p9, %p162_p8 }
  0x18   : > { %s2453_s16 = scalar_select %p38_p10, %s2296_s23, %s40_s8  }
  0x19   : > { %s2456_s17 = scalar_select %p150_p11, %s2284_s20, %s152_s11  }
  0x1a   : > { %4716 = sst [smem:[#allocation13_spill]] %s2453_s16  ;;  %p168_p13 = scmp.ne.s32.totalorder %s2280_s19, %s2276_s18 }
  0x1b   : > { %p169_p0 = scmp.eq.s32.totalorder %s1973_s30, 7  ;;  %p2042_p1 = scmp.lt.s32.totalorder %s2316_s28, 8 }
  0x1c   : > { %s201_s7 = sand.u32 1, %s2296_s23   ;;  %s2026_s6 = smul.u32 4224, %s2312_s27 }
  0x1d   : > { %p2461_p2 = por %p169_p0, %p168_p13  ;;  %s2025_s29 = smul.u32 264, %s201_s7 }
  0x1e   : > { %p2469_p4 = pnand %p2042_p1, %p2430_p3  ;;  %p1977_p5 = scmp.ge.s32.totalorder %s2316_s28, 1 }
  0x1f   : > { %s4717_s21 = scalar_select %p2461_p2, 1, 0 }
  0x20   : > { %s211_s13 = scalar_lea.hbm %s4641_s0, %s2026_s6  ;;  %s205_s30 = scalar_lea.vmem [#allocation2], %s2025_s29 }
  0x21   : > { %s213_s14 = sshll.u32 %s205_s30, 4  ;;  %s202_s26 = scalar_lea.sflag [#allocation3], %s201_s7  ;;  %s214_s14 = int_to_ptr.vmem [resolvable:$true] %s213_s14 }
  0x22   : > { %p2170_p6 = pneg %p2469_p4  ;;  %s2181_s16 = scalar_lea.vmem %s214_s14, 4224 }
  0x23   : > { %p2182_p8 = scmp.ne.s32.totalorder %s214_s14, %s2181_s16  ;;  %s2318_s9 = smov [#allocation2]  }
  0x24   : > { %s2186_s27 = sshll.u32 %s2318_s9, 4  ;;  %s2187_s27 = int_to_ptr.vmem [resolvable:$false] %s2186_s27 }
  0x25   : > { %p2184_p9 = pnand %p2182_p8, %p2170_p6  ;;  %s2188_s23 = scalar_lea.vmem %s2187_s27, 8448 }
  0x26   : > { %p2189_p3 = scmp.lt.s32.totalorder %s214_s14, %s2187_s27  ;;  %p2190_p11 = scmp.lt.s32.totalorder %s2188_s23, %s2181_s16 }
  0x27   : > { %p2185_p10 = pneg %p2184_p9 }
  0x28   : > { %p2191_p13 = por %p2190_p11, %p2189_p3 }
  0x2a   : > { %p2192_p0 = pnand %p2191_p13, %p2185_p10 }
  0x2c   : > { %2195 = shalt.err (!%p2192_p0)
}
  0x2d   : > { %2037 = dma.hbm_to_vmem [thread:$0]  (!%p2469_p4), %s211_s13, 4224, %s214_s14, %s202_s26  }
  0x2e   : > { %p218_p1 = scmp.lt.s32.totalorder %s2316_s28, 9 }
  0x30   : > { %p219_p2 = pnand %p1977_p5, %p218_p1 }
  0x32   : > { %222 = sbr.rel (%p219_p2) target bundleno = 658 (0x292), region = 40 }
  0x37   : > { %s224_s6 = sand.u32 1, %s2292_s22  }
  0x38   : > { %s2027_s7 = smul.u32 264, %s224_s6  ;;  %s225_s29 = scalar_lea.sflag [#allocation3], %s224_s6 }
  0x3a   : > { %s228_s8 = scalar_lea.vmem [#allocation2], %s2027_s7 }
  0x3b   : > { %2267 = dma.done.wait (%p2440_p7), %s225_s29, 4224  }
  0x3c   : > { %2269 = vsyncadd (%p2440_p7), %s225_s29, 4294963072  ;;  %s1978_s23 = sshll.u32 %s2300_s24, 10  ;;  %v2319_v0 = vmov 0.0   ;;  %v4652_v1 = vmov 0   ;;  %v270_v4 = vld [vmem:[%s4642_s1] sm:$0xff]  ;;  %vm291_vm0 = vcmask 64512   ;;  %v713_v39 = vlaneseq }
  0x3d   : > { %s257_s26 = sshra.s32 %s1978_s23, 7  ;;  %365 = vmatprep.mubr.f32.mxu0 %v2319_v0  ;;  %371 = vmatprep.mubr.f32.mxu1 %v2319_v0  ;;  %v2506_v5 = vld [vmem:[%s4642_s1 + $0x8] sm:$0xff]  ;;  %v275_v9 = vld [vmem:[%s4643_s2 + $0x10] sm:$0xff]  ;;  %v2528_v12 = vld [vmem:[%s4644_s3] sm:$0xff]  ;;  %vm2321_vm1 = vmmov 0   ;;  %v2322_v19 = vmov 1   ;;  %v2632_v43 = vstv %s1978_s23 }
  0x3e   : > { %s1979_s27 = sshll.u32 %s257_s26, 3  ;;  %2149 = vset.pattern.permute.xlu1 %v4652_v1  ;;  %2148 = vset.pattern.permute.xlu0 %v4652_v1  ;;  %v272_v10 = vld [vmem:[%s4642_s1 + $0x10] sm:$0xff]  ;;  %v273_v15 = vld [vmem:[%s4643_s2] sm:$0xff]  ;;  %v274_v18 = vld [vmem:[%s4643_s2 + $0x8] sm:$0xff]  ;;  %v2323_v21 = vmov 2   ;;  %v2324_v22 = vmov 3  }
  0x3f   : > { %s2496_s16 = scalar_lea.vmem %s228_s8, %s1979_s27 [#allocation2]  ;;  %288 = vperm.xlu1 %2149, %v275_v9   ;;  %v2545_v16 = vld [vmem:[%s4644_s3 + $0x10] sm:$0xff]  ;;  %278 = vperm.xlu0 %2148, %v273_v15   ;;  %v2563_v20 = vld [vmem:[%s4644_s3 + $0x8] sm:$0xff]  ;;  %v2325_v23 = vmov 4   ;;  %v2326_v24 = vmov 5   ;;  %v2327_v25 = vmov 6   ;;  %v2328_v26 = vmov 7  }
  0x40   : > { %v262_v2 = vld [vmem:[%s2496_s16 + $0x8] sm:$0xff]  ;;  %v261_v3 = vld [vmem:[%s2496_s16] sm:$0xff]  ;;  %v264_v8 = vld [vmem:[%s2496_s16 + $0x18] sm:$0xff]  ;;  %v2329_v37 = vmov 8   ;;  %v2626_v41 = vand.u32 127, %v713_v39  ;;  %s2330_s23 = smov 1  }
  0x41   : > { %331 = vmatprep.subr.mxu0 %v262_v2  ;;  %2023 = vmatprep.subr.mxu1 %v262_v2  ;;  %v266_v6 = vld [vmem:[%s2496_s16 + $0x28] sm:$0xff]  ;;  %v265_v7 = vld [vmem:[%s2496_s16 + $0x20] sm:$0xff]  ;;  %v263_v11 = vld [vmem:[%s2496_s16 + $0x10] sm:$0xff]  ;;  %s2331_s30 = smov 127   ;;  %s2332_s6 = smov 64  }
  0x42   : > { %332 = vmatpush1.msra.mxu0 %v261_v3  ;;  %2024 = vmatpush1.msra.mxu1 %v261_v3  ;;  %v269_v13 = vld [vmem:[%s2496_s16 + $0x40] sm:$0xff]  ;;  %v268_v14 = vld [vmem:[%s2496_s16 + $0x38] sm:$0xff]  ;;  %v267_v17 = vld [vmem:[%s2496_s16 + $0x30] sm:$0xff]  ;;  %v715_v44 = vadd.s32 128, %v2626_v41  ;;  %v2639_v46 = vadd.s32 %v2632_v43, %v2626_v41  ;;  %v718_v51 = vadd.s32 512, %v2626_v41  ;;  %v719_v57 = vadd.s32 640, %v2626_v41 }
  0x43   : > { %1980 = vmatmul.mubr.msk.f32.vlgmr.msra.gmra.mxu0 %vm291_vm0, %v270_v4  ;;  %1981 = vmatmul.mubr.msk.f32.vlgmr.msra.gmra.mxu1 %vm291_vm0, %v2506_v5  ;;  %v716_v61 = vadd.s32 256, %v2626_v41  ;;  %s252_s27 = sand.u32 1, %s2280_s19   ;;  %s2029_s11 = smul.u32 96, %s2304_s25 }
  0x44   : > { %497 = vmatprep.subr.mxu0 %v266_v6  ;;  %377 = vmatprep.mubr.f32.mxu1 %v2319_v0  ;;  %v2644_v48 = vadd.s32 %v2632_v43, %v715_v44  ;;  %vm733_vm2 = vcmp.ge.s32.totalorder %v2639_v46, 64  ;;  %vm742_vm3 = vcmp.lt.s32.totalorder %v2639_v46, 4160  ;;  %v2677_v2 = vadd.s32 %v2632_v43, %v718_v51  ;;  %s2028_s12 = smul.u32 192, %s252_s27  ;;  %s2004_s16 = sshll.u32 %s2300_s24, 3 }
  0x45   : > { %498 = vmatpush1.msra.mxu0 %v265_v7  ;;  %531 = vmatprep.mubr.f32.mxu0 %v2319_v0  ;;  %vm2655_vm6 = vmand %vm733_vm2, %vm742_vm3  ;;  %v717_v6 = vadd.s32 384, %v2626_v41  ;;  %s4542_s13 = sadd.s32 %s2029_s11, %s2004_s16  ;;  %s4580_s9 = scalar_lea.sflag [#allocation4], %s252_s27 }
  0x46   : > { %414 = vmatprep.subr.mxu1 %v264_v8  ;;  %2012 = vmatprep.subr.mxu0 %v2319_v0  ;;  %vm734_vm4 = vcmp.ge.s32.totalorder %v2644_v48, 64  ;;  %vm743_vm5 = vcmp.lt.s32.totalorder %v2644_v48, 4160  ;;  %v2691_v8 = vadd.s32 %v2632_v43, %v719_v57  ;;  %vm737_vm8 = vcmp.ge.s32.totalorder %v2677_v2, 64  ;;  %s4406_s10 = scalar_lea.vmem [#allocation5], %s2028_s12  ;;  %s2005_s25 = sshll.u32 %s4542_s13, 7 }
  0x47   : > { %1982 = vmatmul.mubr.msk.f32.gmra.mxu1 %vm291_vm0, %v272_v10  ;;  %1986 = vmatmul.mubr.msk.f32.vlgmr.msra.gmra.mxu0 %vm291_vm0, %v270_v4  ;;  %vm2662_vm7 = vmand %vm734_vm4, %vm743_vm5  ;;  %vm746_vm9 = vcmp.lt.s32.totalorder %v2677_v2, 4160  ;;  %s1883_s24 = sshll.u32 %s4406_s10, 4  ;;  %s4568_s14 = scalar_lea.hbm %s4646_s5, %s2005_s25  ;;  %s4561_s24 = int_to_ptr.vmem [resolvable:$true] %s1883_s24 }
  0x48   : > { %415 = vmatpush1.msra.mxu1 %v263_v11  ;;  %448 = vmatprep.mubr.f32.mxu1 %v2319_v0  ;;  %v2696_v11 = vadd.s32 %v2632_v43, %v716_v61  ;;  %vm738_vm10 = vcmp.ge.s32.totalorder %v2691_v8, 64  ;;  %vm747_vm11 = vcmp.lt.s32.totalorder %v2691_v8, 4160  ;;  %vm2717_vm12 = vmand %vm737_vm8, %vm746_vm9  ;;  %s2196_s7 = scalar_lea.vmem %s4561_s24, 3072  ;;  %s2333_s29 = smov [#allocation5]  }
  0x49   : > { %537 = vmatprep.mubr.f32.mxu0 %v2319_v0  ;;  %1190 = vperm.xlu1 %2149, %v2528_v12   ;;  %vm2733_vm15 = vmand %vm738_vm10, %vm747_vm11  ;;  %p2197_p7 = scmp.ne.s32.totalorder %s4561_s24, %s2196_s7  ;;  %s2200_s8 = sshll.u32 %s2333_s29, 4  ;;  %s2201_s8 = int_to_ptr.vmem [resolvable:$false] %s2200_s8 }
  0x4a   : > { %2013 = vmatpush3.msra.mxu0 %v269_v13  ;;  %580 = vmatprep.subr.mxu1 %v268_v14  ;;  %vm735_vm13 = vcmp.ge.s32.totalorder %v2696_v11, 64  ;;  %vm744_vm14 = vcmp.lt.s32.totalorder %v2696_v11, 4160  ;;  %s2202_s26 = scalar_lea.vmem %s2201_s8, 6144  ;;  %p2203_p5 = scmp.lt.s32.totalorder %s4561_s24, %s2201_s8 }
  0x4b   : > { %1983 = vmatmul.mubr.msk.f32.vlgmr.msra.gmra.mxu1 %vm291_vm0, %v270_v4  ;;  %1987 = vmatmul.mubr.msk.f32.gmra.mxu0 %vm291_vm0, %v2506_v5  ;;  %vm2757_vm2 = vmand %vm735_vm13, %vm744_vm14  ;;  %vm812_vm13 = vcmp.lt.s32.totalorder %v2644_v48, 0  ;;  %vm805_vm14 = vcmp.lt.s32.totalorder %v2639_v46, 0  ;;  %p2198_p2 = pnand %p2197_p7, %p2448_p12  ;;  %p2204_p6 = scmp.lt.s32.totalorder %s2202_s26, %s2196_s7 }
  0x4c   : > { %454 = vmatprep.mubr.f32.mxu1 %v2319_v0  ;;  %543 = vmatprep.mubr.f32.mxu0 %v2319_v0 }
  0x4d   : > { %1200 = vperm.xlu1 %2149, %v2545_v16   ;;  %581 = vmatpush1.msra.mxu1 %v267_v17  ;;  %p2199_p4 = pneg %p2198_p2  ;;  %p2205_p8 = por %p2204_p6, %p2203_p5 }
  0x4e   : > { %283 = vperm.xlu0 %2148, %v274_v18   ;;  %v2710_v18 = vadd.s32 %v2632_v43, %v717_v6 }
  0x4f   : > { %1984 = vmatmul.mubr.msk.f32.gmra.mxu1 %vm291_vm0, %v2506_v5  ;;  %1988 = vmatmul.mubr.msk.f32.gmra.mxu0 %vm291_vm0, %v272_v10  ;;  %p2206_p9 = pnand %p2205_p8, %p2199_p4 }
  0x50   : > { %460 = vmatprep.mubr.f32.mxu1 %v2319_v0  ;;  %2014 = vmatprep.mubr.msk.f32.mxu0 %vm2321_vm1, %v2319_v0 }
  0x51   : > { %2151 = vset.pattern.permute.xlu1 %v2322_v19 }
  0x52   : > { %1232 = vperm.xlu1 %2151, %v2563_v20   ;;  %2150 = vset.pattern.permute.xlu0 %v2322_v19 }
  0x53   : > { %1985 = vmatmul.mubr.msk.f32.gmra.mxu1 %vm291_vm0, %v272_v10  ;;  %2015 = vmatmul.mubr.msk.f32.vlgmr.msra.gmra.mxu0 %vm291_vm0, %v270_v4 }
  0x54   : > { %614 = vmatprep.mubr.f32.mxu1 %v2319_v0  ;;  %2017 = vmatprep.mubr.msk.f32.mxu0 %vm2321_vm1, %v2319_v0 }
  0x55   : > { %1228 = vperm.xlu0 %2150, %v2528_v12  }
  0x56   : > { %1236 = vperm.xlu1 %2151, %v2545_v16  }
  0x57   : > { %1989 = vmatmul.mubr.msk.f32.vlgmr.msra.gmra.mxu1 %vm291_vm0, %v270_v4  ;;  %2018 = vmatmul.mubr.msk.f32.gmra.mxu0 %vm291_vm0, %v2506_v5 }
  0x58   : > { %620 = vmatprep.mubr.f32.mxu1 %v2319_v0  ;;  %2020 = vmatprep.mubr.msk.f32.mxu0 %vm2321_vm1, %v2319_v0  ;;  %vm745_vm1 = vcmp.lt.s32.totalorder %v2710_v18, 4160 }
  0x59   : > { %2152 = vset.pattern.permute.xlu0 %v2323_v21 }
  0x5a   : > { %1288 = vperm.xlu0 %2152, %v2528_v12   ;;  %2153 = vset.pattern.permute.xlu1 %v2323_v21 }
  0x5b   : > { %1990 = vmatmul.mubr.msk.f32.gmra.mxu1 %vm291_vm0, %v2506_v5  ;;  %2021 = vmatmul.mubr.msk.f32.gmra.mxu0 %vm291_vm0, %v272_v10 }
  0x5c   : > { %626 = vmatprep.mubr.f32.mxu1 %v2319_v0  ;;  %1292 = vperm.xlu1 %2153, %v2563_v20  }
  0x5e   : > { %2154 = vset.pattern.permute.xlu0 %v2324_v22 }
  0x5f   : > { %1991 = vmatmul.mubr.msk.f32.gmra.mxu1 %vm291_vm0, %v272_v10  ;;  %1348 = vperm.xlu0 %2154, %v2528_v12   ;;  %vm736_vm0 = vcmp.ge.s32.totalorder %v2710_v18, 64 }
  0x60   : > { %1296 = vperm.xlu1 %2153, %v2545_v16   ;;  %vm2775_vm3 = vmand %vm736_vm0, %vm745_vm1 }
  0x63   : > { %2156 = vset.pattern.permute.xlu0 %v2325_v23 }
  0x64   : > { %2155 = vset.pattern.permute.xlu1 %v2324_v22  ;;  %1387 = vperm.xlu0 %2156, %v2528_v12  }
  0x65   : > { %1352 = vperm.xlu1 %2155, %v2563_v20  }
  0x68   : > { %2158 = vset.pattern.permute.xlu0 %v2326_v24 }
  0x69   : > { %1356 = vperm.xlu1 %2155, %v2545_v16   ;;  %1453 = vperm.xlu0 %2158, %v2528_v12  }
  0x6d   : > { %2157 = vset.pattern.permute.xlu1 %v2325_v23  ;;  %2160 = vset.pattern.permute.xlu0 %v2327_v25 }
  0x6e   : > { %1391 = vperm.xlu1 %2157, %v2563_v20   ;;  %1519 = vperm.xlu0 %2160, %v2528_v12  }
  0x72   : > { %1395 = vperm.xlu1 %2157, %v2545_v16   ;;  %2162 = vset.pattern.permute.xlu0 %v2328_v26 }
  0x73   : > { %1555 = vperm.xlu0 %2162, %v2528_v12  }
  0x76   : > { %2159 = vset.pattern.permute.xlu1 %v2326_v24 }
  0x77   : > { %1457 = vperm.xlu1 %2159, %v2563_v20   ;;  %2164 = vset.pattern.permute.xlu0 %v2329_v37 }
  0x7b   : > { %1461 = vperm.xlu1 %2159, %v2545_v16  }
  0x7f   : > { %2161 = vset.pattern.permute.xlu1 %v2327_v25 }
  0x80   : > { %1523 = vperm.xlu1 %2161, %v2563_v20  }
  0x84   : > { %1527 = vperm.xlu1 %2161, %v2545_v16  }
  0x88   : > { %2163 = vset.pattern.permute.xlu1 %v2328_v26 }
  0x89   : > { %1559 = vperm.xlu1 %2163, %v2563_v20  }
  0x8d   : > { %1563 = vperm.xlu1 %2163, %v2545_v16  }
  0x91   : > { %2166 = vset.pattern.permute.xlu1 %v2329_v37  ;;  %v722_v37 = vadd.s32 1024, %v2626_v41 }
  0x93   : > { %v2771_v6 = vadd.s32 %v2632_v43, %v722_v37 }
  0x95   : > { %vm741_vm4 = vcmp.ge.s32.totalorder %v2771_v6, 64  ;;  %vm750_vm5 = vcmp.lt.s32.totalorder %v2771_v6, 4160 }
  0xba   : > { %v2602_v27 = vpop.permute.xlu1 %288  ;;  %v2635_v45 = vpop.permute.xlu0 %278 }
  0xc4   : > { %v2604_v28 = vpop.permute.xlu1 %1190 }
  0xc8   : > { %v2606_v29 = vpop.permute.xlu1 %1200 }
  0xc9   : > { %4719 = vst [vmem:[#allocation14_spill] sm:$0xff] %v2606_v29  ;;  %v2650_v50 = vpop.permute.xlu0 %283 }
  0xcd   : > { %v2608_v30 = vpop.permute.xlu1 %1232 }
  0xd1   : > { %v2610_v31 = vpop.permute.xlu1 %1236 }
  0xd7   : > { %v2612_v32 = vpop.permute.xlu1 %1292 }
  0xd8   : > { %4720 = vst [vmem:[#allocation15_spill] sm:$0xff] %v2612_v32 }
  0xdb   : > { %v2614_v33 = vpop.permute.xlu1 %1296 }
  0xdc   : > { %4721 = vst [vmem:[#allocation16_spill] sm:$0xff] %v2614_v33 }
  0xe0   : > { %v2616_v34 = vpop.permute.xlu1 %1352 }
  0xe1   : > { %4722 = vst [vmem:[#allocation17_spill] sm:$0xff] %v2616_v34 }
  0xe4   : > { %v2618_v35 = vpop.permute.xlu1 %1356 }
  0xe5   : > { %4723 = vst [vmem:[#allocation18_spill] sm:$0xff] %v2618_v35 }
  0xe9   : > { %v2620_v36 = vpop.permute.xlu1 %1391 }
  0xed   : > { %v2622_v38 = vpop.permute.xlu1 %1395 }
  0xf2   : > { %v2624_v40 = vpop.permute.xlu1 %1457 }
  0xf3   : > { %4724 = vst [vmem:[#allocation19_spill] sm:$0xff] %v2624_v40 }
  0xf6   : > { %v2628_v42 = vpop.permute.xlu1 %1461 }
  0xf7   : > { %4725 = vst [vmem:[#allocation20_spill] sm:$0xff] %v2628_v42 }
  0xfb   : > { %v2641_v47 = vpop.permute.xlu1 %1523 }
  0xfc   : > { %4726 = vst [vmem:[#allocation21_spill] sm:$0xff] %v2641_v47 }
  0xff   : > { %v2648_v49 = vpop.permute.xlu1 %1527 }
 0x100   : > { %4727 = vst [vmem:[#allocation22_spill] sm:$0xff] %v2648_v49 }
 0x103   : > { %v367_v52 = vpop.f32.mrf.mxu0  ;;  %v373_v54 = vpop.f32.mrf.mxu1 }
 0x104   : > { %v368_v55 = vadd.f32 %v367_v52, %v2635_v45  ;;  %v374_v56 = vadd.f32 %v373_v54, %v2650_v50  ;;  %v2679_v3 = vpop.permute.xlu1 %1559 }
 0x105   : > { %v369_v58 = vpop.f32.mrf.mxu0  ;;  %v375_v60 = vpop.f32.mrf.mxu1 }
 0x106   : > { %v2669_v62 = vsel %vm2655_vm6, %v368_v55, 0.0  ;;  %v2673_v63 = vsel %vm2655_vm6, %v374_v56, 0.0  ;;  %v376_v0 = vadd.f32 %v375_v60, %v2650_v50  ;;  %v370_v14 = vadd.f32 %v369_v58, %v2635_v45 }
 0x107   : > { %v379_v4 = vpop.f32.mrf.mxu1  ;;  %924 = vrot.lane.b32.xlu0 %v2673_v63, %s2330_s23  ;;  %v533_v5 = vpop.f32.mrf.mxu0  ;;  %922 = vrot.lane.b32.xlu1 %v2669_v62, %s2330_s23 }
 0x108   : > { %v2686_v7 = vsel %vm2662_vm7, %v376_v0, 0.0  ;;  %v2725_v24 = vsel %vm2662_vm7, %v370_v14, 0.0  ;;  %v380_v54 = vadd.f32 %v379_v4, %v2602_v27 }
 0x109   : > { %v381_v9 = vpop.f32.mrf.mxu1  ;;  %v2693_v10 = vpop.f32.mrf.mxu0  ;;  %v2700_v13 = vmul.f32 %v2679_v3, %v2686_v7 }
 0x10b   : > { %4732 = vst [vmem:[#allocation23_spill] sm:$0xff] %v2700_v13  ;;  %v2705_v15 = vpop.f32.mrf.mxu1  ;;  %v539_v17 = vpop.f32.mrf.mxu0  ;;  %1058 = vrot.lane.b32.xlu0 %v2669_v62, %s2331_s30  ;;  %1060 = vrot.lane.b32.xlu1 %v2673_v63, %s2331_s30 }
 0x10c   : > { %v540_v19 = vadd.f32 %v539_v17, %v2650_v50 }
 0x10d   : > { %v452_v22 = vpop.f32.mrf.mxu1  ;;  %v541_v23 = vpop.f32.mrf.mxu0 }
 0x10e   : > { %v2729_v25 = vsel %vm2717_vm12, %v540_v19, 0.0  ;;  %v542_v26 = vadd.f32 %v541_v23, %v2650_v50  ;;  %v2787_v23 = vsel %vm2655_vm6, %v380_v54, 0.0  ;;  %vm2807_vm6 = vmand %vm741_vm4, %vm750_vm5  ;;  %vm840_vm5 = vcmp.lt.s32.totalorder %v2691_v8, 0 }
 0x10f   : > { %v2739_v44 = vmul.f32 %v2679_v3, %v2729_v25  ;;  %v456_v51 = vpop.f32.mrf.mxu1  ;;  %v545_v52 = vpop.f32.mrf.mxu0  ;;  %928 = vrot.lane.b32.xlu0 %v2725_v24, %s2330_s23  ;;  %930 = vrot.lane.b32.xlu1 %v2686_v7, %s2330_s23 }
 0x110   : > { %v2748_v55 = vsel %vm2733_vm15, %v542_v26, 0.0  ;;  %v457_v56 = vadd.f32 %v456_v51, %v2650_v50 }
 0x111   : > { %4737 = vst [vmem:[#allocation24_spill] sm:$0xff] %v2739_v44  ;;  %4738 = vst [vmem:[#allocation25_spill] sm:$0xff] %v2748_v55  ;;  %v2763_v58 = vmul.f32 %v2679_v3, %v2748_v55  ;;  %v458_v60 = vpop.f32.mrf.mxu1  ;;  %v547_v61 = vpop.f32.mrf.mxu0 }
 0x112   : > { %v2767_v0 = vsel %vm2757_vm2, %v457_v56, 0.0  ;;  %v459_v4 = vadd.f32 %v458_v60, %v2650_v50  ;;  %v534_v56 = vadd.f32 %v533_v5, %v2635_v45 }
 0x113   : > { %4741 = vst [vmem:[#allocation26_spill] sm:$0xff] %v2763_v58  ;;  %v2781_v17 = vmul.f32 %v2679_v3, %v2767_v0  ;;  %v699_v19 = vpop.f32.mrf.mxu0  ;;  %1066 = vrot.lane.b32.xlu0 %v2686_v7, %s2331_s30  ;;  %1064 = vrot.lane.b32.xlu1 %v2725_v24, %s2331_s30  ;;  %v462_v21 = vpop.f32.mrf.mxu1 }
 0x114   : > { %v2791_v26 = vsel %vm2775_vm3, %v459_v4, 0.0  ;;  %v2813_v5 = vsel %vm2717_vm12, %v534_v56, 0.0 }
 0x115   : > { %4744 = vst [vmem:[#allocation27_spill] sm:$0xff] %v2781_v17  ;;  %v2797_v37 = vmul.f32 %v2679_v3, %v2791_v26  ;;  %v2016_v51 = vpop.f32.mrf.mxu0  ;;  %v2943_v17 = vpop.permute.xlu0 %1228 }
 0x116   : > { %v382_v51 = vadd.f32 %v381_v9, %v2602_v27 }
 0x117   : > { %4745 = vst [vmem:[#allocation28_spill] sm:$0xff] %v2797_v37  ;;  %v704_v53 = vpop.f32.mrf.mxu0  ;;  %1062 = vrot.lane.b32.xlu0 %v2787_v23, %s2331_s30  ;;  %926 = vrot.lane.b32.xlu1 %v2787_v23, %s2330_s23  ;;  %v813_v37 = vsub.s32 0, %v2644_v48 }
 0x118   : > { %v705_v54 = vadd.f32 %v704_v53, %v2650_v50  ;;  %v2832_v9 = vsel %vm2662_vm7, %v382_v51, 0.0  ;;  %v546_v51 = vadd.f32 %v545_v52, %v2602_v27 }
 0x119   : > { %v2019_v4 = vpop.f32.mrf.mxu0 }
 0x11a   : > { %v2818_v1 = vsel %vm2807_vm6, %v705_v54, 0.0  ;;  %v536_v54 = vadd.f32 %v2693_v10, %v2635_v45  ;;  %v453_v10 = vadd.f32 %v452_v22, %v2635_v45  ;;  %v2878_v22 = vsel %vm2717_vm12, %v546_v51, 0.0  ;;  %v464_v51 = vpop.f32.mrf.mxu1 }
 0x11b   : > { %v2822_v53 = vmul.f32 %v2679_v3, %v2818_v1  ;;  %v2824_v44 = vpop.f32.mrf.mxu0  ;;  %1082 = vrot.lane.b32.xlu0 %v2813_v5, %s2331_s30  ;;  %946 = vrot.lane.b32.xlu1 %v2813_v5, %s2330_s23  ;;  %v465_v57 = vadd.f32 %v464_v51, %v2602_v27  ;;  %v841_v51 = vsub.s32 0, %v2691_v8 }
 0x11c   : > { %v2842_v4 = vsel %vm2733_vm15, %v536_v54, 0.0  ;;  %v548_v54 = vadd.f32 %v547_v61, %v2602_v27  ;;  %v720_v61 = vadd.s32 768, %v2626_v41 }
 0x11d   : > { %4748 = vst [vmem:[#allocation29_spill] sm:$0xff] %v2822_v53  ;;  %v2022_v56 = vpop.f32.mrf.mxu0 }
 0x11e   : > { %v451_v56 = vadd.f32 %v2705_v15, %v2635_v45  ;;  %v2865_v15 = vsel %vm2775_vm3, %v453_v10, 0.0  ;;  %v2891_v52 = vsel %vm2733_vm15, %v548_v54, 0.0  ;;  %v700_v10 = vadd.f32 %v699_v19, %v2635_v45  ;;  %v616_v19 = vpop.f32.mrf.mxu1 }
 0x11f   : > { %932 = vrot.lane.b32.xlu0 %v2832_v9, %s2330_s23  ;;  %1068 = vrot.lane.b32.xlu1 %v2832_v9, %s2331_s30  ;;  %v2913_v54 = vadd.s32 %v2632_v43, %v720_v61  ;;  %v2929_v61 = vsel %vm2775_vm3, %v465_v57, 0.0 }
 0x120   : > { %v2852_v59 = vsel %vm2757_vm2, %v451_v56, 0.0  ;;  %v463_v56 = vadd.f32 %v462_v21, %v2602_v27  ;;  %v2917_v21 = vsel %vm2807_vm6, %v700_v10, 0.0  ;;  %v617_v10 = vadd.f32 %v616_v19, %v2635_v45  ;;  %v618_v57 = vpop.f32.mrf.mxu1  ;;  %v2956_v19 = vpop.permute.xlu0 %1288 }
 0x121   : > { %vm739_vm7 = vcmp.ge.s32.totalorder %v2913_v54, 64  ;;  %vm748_vm8 = vcmp.lt.s32.totalorder %v2913_v54, 4160  ;;  %4751 = vst [vmem:[#allocation30_spill] sm:$0xff] %v2956_v19 }
 0x122   : > { %v2905_v39 = vsel %vm2757_vm2, %v463_v56, 0.0  ;;  %v721_v56 = vadd.s32 896, %v2626_v41  ;;  %vm2934_vm9 = vmand %vm739_vm7, %vm748_vm8  ;;  %vm976_vm7 = vcmp.lt.s32.totalorder %v2626_v41, 1  ;;  %vm833_vm8 = vcmp.lt.s32.totalorder %v2677_v2, 0 }
 0x123   : > { %952 = vrot.lane.b32.xlu0 %v2842_v4, %s2330_s23  ;;  %1088 = vrot.lane.b32.xlu1 %v2842_v4, %s2331_s30  ;;  %v2947_v14 = vsel %vm2934_vm9, %v617_v10, 0.0  ;;  %v622_v10 = vpop.f32.mrf.mxu1 }
 0x124   : > { %v2939_v53 = vadd.s32 %v2632_v43, %v721_v56  ;;  %v619_v43 = vadd.f32 %v618_v57, %v2635_v45  ;;  %v623_v42 = vadd.f32 %v622_v10, %v2650_v50  ;;  %v710_v45 = vadd.f32 %v2824_v44, %v2602_v27  ;;  %v2977_v57 = vpop.permute.xlu0 %1348 }
 0x125   : > { %4754 = vst [vmem:[#allocation31_spill] sm:$0xff] %v2977_v57  ;;  %v624_v10 = vpop.f32.mrf.mxu1  ;;  %v2000_v56 = vmin.u32 %v841_v51, %v2691_v8 }
 0x126   : > { %vm740_vm10 = vcmp.ge.s32.totalorder %v2939_v53, 64  ;;  %vm749_vm11 = vcmp.lt.s32.totalorder %v2939_v53, 4160  ;;  %v2981_v33 = vsel %vm2934_vm9, %v623_v42, 0.0  ;;  %v625_v44 = vadd.f32 %v624_v10, %v2650_v50 }
 0x127   : > { %948 = vrot.lane.b32.xlu0 %v2729_v25, %s2330_s23  ;;  %934 = vrot.lane.b32.xlu1 %v2852_v59, %s2330_s23  ;;  %vm2958_vm12 = vmand %vm740_vm10, %vm749_vm11  ;;  %v628_v19 = vpop.f32.mrf.mxu1  ;;  %v806_v10 = vsub.s32 0, %v2639_v46 }
 0x128   : > { %v2968_v58 = vsel %vm2958_vm12, %v619_v43, 0.0  ;;  %v2985_v43 = vsel %vm2807_vm6, %v710_v45, 0.0  ;;  %v2993_v35 = vpop.permute.xlu0 %1387  ;;  %v3001_v42 = vsel %vm2958_vm12, %v625_v44, 0.0  ;;  %v629_v60 = vadd.f32 %v628_v19, %v2602_v27 }
 0x129   : > { %v1996_v45 = vmin.u32 %v813_v37, %v2644_v48  ;;  %v630_v50 = vpop.f32.mrf.mxu1  ;;  %v1995_v37 = vmin.u32 %v806_v10, %v2639_v46  ;;  %v820_v48 = vsub.s32 0, %v2696_v11  ;;  %v844_v46 = vand.u32 63, %v2000_v56 }
 0x12a   : > { %v3014_v32 = vsel %vm2934_vm9, %v629_v60, 0.0  ;;  %v631_v44 = vadd.f32 %v630_v50, %v2602_v27  ;;  %v834_v50 = vsub.s32 0, %v2677_v2  ;;  %vm819_vm9 = vcmp.lt.s32.totalorder %v2696_v11, 0 }
 0x12b   : > { %1070 = vrot.lane.b32.xlu0 %v2852_v59, %s2331_s30  ;;  %1084 = vrot.lane.b32.xlu1 %v2729_v25, %s2331_s30  ;;  %v816_v19 = vand.u32 63, %v1996_v45  ;;  %v809_v27 = vand.u32 63, %v1995_v37 }
 0x12c   : > { %v3010_v40 = vpop.permute.xlu0 %1453  ;;  %v3024_v13 = vsel %vm2958_vm12, %v631_v44, 0.0  ;;  %v3042_v44 = vpop.permute.xlu1 %1563  ;;  %v1999_v37 = vmin.u32 %v834_v50, %v2677_v2  ;;  %v3111_v2 = vmul.f32 %v2993_v35, %v2842_v4 }
 0x12d   : > { %4755 = vst [vmem:[#allocation32_spill] sm:$0xff] %v3010_v40  ;;  %v817_v47 = vsub.s32 0, %v816_v19  ;;  %v810_v45 = vsub.s32 0, %v809_v27  ;;  %v1997_v40 = vmin.u32 %v820_v48, %v2696_v11  ;;  %v1240_v11 = vmul.f32 %v2943_v17, %v2725_v24 }
 0x12e   : > { %4769 = vst [vmem:[#allocation45_spill] sm:$0xff] %v3111_v2 }
 0x12f   : > { %940 = vrot.lane.b32.xlu0 %v2865_v15, %s2330_s23  ;;  %954 = vrot.lane.b32.xlu1 %v2748_v55, %s2330_s23  ;;  %v818_v60 = vsel %vm812_vm13, %v817_v47, %v816_v19  ;;  %v4756_v47 = vmov 0   ;;  %v811_v19 = vsel %vm805_vm14, %v810_v45, %v809_v27  ;;  %v1801_v27 = vld [vmem:[%s4645_s4] sm:$0xff]  ;;  %v823_v50 = vand.u32 63, %v1997_v40 }
 0x130   : > { %v3026_v34 = vpop.permute.xlu0 %1519  ;;  %vm869_vm15 = vcmp.ne.s32.totalorder %v818_v60, 0  ;;  %vm878_vm0 = vcmp.lt.s32.totalorder %v818_v60, 0  ;;  %vm868_vm2 = vcmp.ne.s32.totalorder %v811_v19, 0  ;;  %vm877_vm3 = vcmp.lt.s32.totalorder %v811_v19, 0 }
 0x131   : > { %vm887_vm1 = vmand %vm878_vm0, %vm869_vm15  ;;  %v3080_v40 = vmul.f32 %v2620_v36, %v2673_v63 }
 0x132   : > { %vm886_vm4 = vmand %vm877_vm3, %vm868_vm2 }
 0x133   : > { %1090 = vrot.lane.b32.xlu0 %v2748_v55, %s2331_s30  ;;  %1076 = vrot.lane.b32.xlu1 %v2865_v15, %s2331_s30  ;;  %v837_v55 = vand.u32 63, %v1999_v37  ;;  %4764 = vst [vmem:[#allocation40_spill] sm:$0xff] %v3080_v40 }
 0x134   : > { %v3039_v10 = vpop.permute.xlu0 %1555 }
 0x135   : > { %v1566_v8 = vmul.f32 %v3039_v10, %v2725_v24  ;;  %v3125_v40 = vmul.f32 %v3039_v10, %v2842_v4 }
 0x137   : > { %936 = vrot.lane.b32.xlu0 %v2767_v0, %s2330_s23  ;;  %950 = vrot.lane.b32.xlu1 %v2878_v22, %s2330_s23 }
 0x13b   : > { %1086 = vrot.lane.b32.xlu0 %v2878_v22, %s2331_s30  ;;  %1072 = vrot.lane.b32.xlu1 %v2767_v0, %s2331_s30 }
 0x13f   : > { %956 = vrot.lane.b32.xlu0 %v2891_v52, %s2330_s23  ;;  %942 = vrot.lane.b32.xlu1 %v2791_v26, %s2330_s23 }
 0x143   : > { %1078 = vrot.lane.b32.xlu0 %v2791_v26, %s2331_s30  ;;  %1092 = vrot.lane.b32.xlu1 %v2891_v52, %s2331_s30 }
 0x147   : > { %1074 = vrot.lane.b32.xlu0 %v2905_v39, %s2331_s30  ;;  %938 = vrot.lane.b32.xlu1 %v2905_v39, %s2330_s23 }
 0x14b   : > { %1106 = vrot.lane.b32.xlu0 %v2917_v21, %s2331_s30  ;;  %970 = vrot.lane.b32.xlu1 %v2917_v21, %s2330_s23 }
 0x14f   : > { %944 = vrot.lane.b32.xlu0 %v2929_v61, %s2330_s23  ;;  %1080 = vrot.lane.b32.xlu1 %v2929_v61, %s2331_s30 }
 0x153   : > { %972 = vrot.lane.b32.xlu0 %v2818_v1, %s2330_s23  ;;  %958 = vrot.lane.b32.xlu1 %v2947_v14, %s2330_s23 }
 0x157   : > { %1094 = vrot.lane.b32.xlu0 %v2947_v14, %s2331_s30  ;;  %1108 = vrot.lane.b32.xlu1 %v2818_v1, %s2331_s30 }
 0x15b   : > { %964 = vrot.lane.b32.xlu0 %v2968_v58, %s2330_s23  ;;  %1100 = vrot.lane.b32.xlu1 %v2968_v58, %s2331_s30 }
 0x15f   : > { %960 = vrot.lane.b32.xlu0 %v2981_v33, %s2330_s23  ;;  %974 = vrot.lane.b32.xlu1 %v2985_v43, %s2330_s23 }
 0x163   : > { %1110 = vrot.lane.b32.xlu0 %v2985_v43, %s2331_s30  ;;  %1096 = vrot.lane.b32.xlu1 %v2981_v33, %s2331_s30 }
 0x167   : > { %1102 = vrot.lane.b32.xlu0 %v3001_v42, %s2331_s30  ;;  %966 = vrot.lane.b32.xlu1 %v3001_v42, %s2330_s23 }
 0x16b   : > { %1098 = vrot.lane.b32.xlu0 %v3014_v32, %s2331_s30  ;;  %962 = vrot.lane.b32.xlu1 %v3014_v32, %s2330_s23 }
 0x16f   : > { %968 = vrot.lane.b32.xlu0 %v3024_v13, %s2330_s23  ;;  %1619 = vperm.xlu1 %2166, %v2563_v20  }
 0x173   : > { %1615 = vperm.xlu0 %2164, %v2528_v12   ;;  %1104 = vrot.lane.b32.xlu1 %v3024_v13, %s2331_s30  ;;  %v896_v12 = vadd.s32 64, %v818_v60 }
 0x175   : > { %v3056_v45 = vsel %vm887_vm1, %v896_v12, %v818_v60  ;;  %v3068_v60 = vmul.f32 %v2943_v17, %v2669_v62  ;;  %v3076_v12 = vmul.f32 %v2608_v30, %v2673_v63  ;;  %v3096_v63 = vmul.f32 %v2622_v38, %v2787_v23 }
 0x176   : > { %vm914_vm6 = vcmp.ge.s32.totalorder %v3056_v45, 1 }
 0x177   : > { %2165 = vset.pattern.permute.xlu0 %v4756_v47  ;;  %1623 = vperm.xlu1 %2166, %v2545_v16   ;;  %v895_v16 = vadd.s32 64, %v811_v19  ;;  %4761 = vst [vmem:[#allocation37_spill] sm:$0xff] %v3068_v60  ;;  %4763 = vst [vmem:[#allocation39_spill] sm:$0xff] %v3076_v12  ;;  %v3088_v60 = vmul.f32 %v2610_v31, %v2787_v23  ;;  %v824_v12 = vsub.s32 0, %v823_v50 }
 0x178   : > { %1195 = vperm.xlu0 %2165, %v2563_v20   ;;  %v845_v20 = vsub.s32 0, %v844_v46  ;;  %4766 = vst [vmem:[#allocation42_spill] sm:$0xff] %v3096_v63 }
 0x179   : > { %v3048_v51 = vpop.permute.xlu0 %924  ;;  %v3051_v57 = vpop.permute.xlu1 %922  ;;  %v3084_v37 = vsel %vm886_vm4, %v895_v16, %v811_v19  ;;  %4765 = vst [vmem:[#allocation41_spill] sm:$0xff] %v3088_v60  ;;  %v3100_v19 = vmul.f32 %v2622_v38, %v2832_v9  ;;  %vm826_vm4 = vcmp.lt.s32.totalorder %v2710_v18, 0 }
 0x17a   : > { %4757 = vst [vmem:[#allocation33_spill] sm:$0xff] %v3048_v51  ;;  %4758 = vst [vmem:[#allocation34_spill] sm:$0xff] %v3051_v57 }
 0x17b   : > { %2167 = vset.pattern.permute.xlu1 %v4756_v47  ;;  %v3072_v47 = vmul.f32 %v2993_v35, %v2669_v62  ;;  %4767 = vst [vmem:[#allocation43_spill] sm:$0xff] %v3100_v19 }
 0x17c   : > { %1806 = vperm.xlu1 %2167, %v1801_v27   ;;  %v846_v27 = vsel %vm840_vm5, %v845_v20, %v844_v46 }
 0x17d   : > { %v3059_v56 = vpop.permute.xlu0 %1058  ;;  %v3062_v48 = vpop.permute.xlu1 %1060  ;;  %4762 = vst [vmem:[#allocation38_spill] sm:$0xff] %v3072_v47  ;;  %v827_v47 = vsub.s32 0, %v2710_v18  ;;  %vm873_vm10 = vcmp.ne.s32.totalorder %v846_v27, 0  ;;  %vm882_vm11 = vcmp.lt.s32.totalorder %v846_v27, 0 }
 0x17e   : > { %4759 = vst [vmem:[#allocation35_spill] sm:$0xff] %v3059_v56  ;;  %4760 = vst [vmem:[#allocation36_spill] sm:$0xff] %v3062_v48  ;;  %v838_v56 = vsub.s32 0, %v837_v55  ;;  %v3132_v48 = vmul.f32 %v3039_v10, %v2852_v59 }
 0x17f   : > { %v1998_v19 = vmin.u32 %v827_v47, %v2710_v18  ;;  %vm891_vm12 = vmand %vm882_vm11, %vm873_vm10  ;;  %v3151_v47 = vmul.f32 %v3039_v10, %v2865_v15  ;;  %v3271_v18 = vmul.f32 %v3042_v44, %v2891_v52  ;;  %vm1112_vm10 = vcmp.lt.s32.totalorder %v2626_v41, 127 }
 0x180   : > { %v839_v60 = vsel %vm833_vm8, %v838_v56, %v837_v55  ;;  %v3140_v56 = vmul.f32 %v3042_v44, %v2832_v9  ;;  %vm1050_vm8 = vcmp.le.s32.totalorder %v3056_v45, 62 }
 0x181   : > { %v3090_v62 = vpop.permute.xlu0 %928  ;;  %v3106_v16 = vpop.permute.xlu1 %930  ;;  %vm872_vm13 = vcmp.ne.s32.totalorder %v839_v60, 0  ;;  %vm881_vm14 = vcmp.lt.s32.totalorder %v839_v60, 0  ;;  %4796 = vst [vmem:[#allocation70_spill] sm:$0xff] %v3271_v18  ;;  %v848_v18 = vsub.s32 0, %v2913_v54 }
 0x182   : > { %v998_v46 = vsel %vm976_vm7, %v3051_v57, %v3090_v62  ;;  %4768 = vst [vmem:[#allocation44_spill] sm:$0xff] %v3106_v16  ;;  %v825_v57 = vsel %vm819_vm9, %v824_v12, %v823_v50  ;;  %v3147_v50 = vmul.f32 %v2620_v36, %v2729_v25  ;;  %v3155_v12 = vmul.f32 %v2620_v36, %v2767_v0  ;;  %vm3183_vm1 = vmand %vm881_vm14, %vm872_vm13 }
 0x183   : > { %v3115_v23 = vsel %vm914_vm6, %v998_v46, 0.0  ;;  %v900_v46 = vadd.s32 64, %v846_v27  ;;  %vm870_vm15 = vcmp.ne.s32.totalorder %v825_v57, 0  ;;  %vm879_vm0 = vcmp.lt.s32.totalorder %v825_v57, 0 }
 0x184   : > { %v1204_v20 = vmul.f32 %v2604_v28, %v3115_v23  ;;  %v1530_v63 = vmul.f32 %v3026_v34, %v3115_v23  ;;  %4772 = vst [vmem:[#allocation48_spill] sm:$0xff] %v3147_v50  ;;  %4773 = vst [vmem:[#allocation49_spill] sm:$0xff] %v3155_v12  ;;  %v3175_v50 = vmul.f32 %v2622_v38, %v2929_v61 }
 0x185   : > { %v3127_v2 = vpop.permute.xlu0 %1066  ;;  %v3136_v55 = vpop.permute.xlu1 %1064  ;;  %vm888_vm2 = vmand %vm879_vm0, %vm870_vm15  ;;  %vm861_vm15 = vcmp.lt.s32.totalorder %v2771_v6, 0  ;;  %vm847_vm0 = vcmp.lt.s32.totalorder %v2913_v54, 0 }
 0x186   : > { %v3134_v51 = vadd.f32 %v1566_v8, %v1530_v63  ;;  %v3143_v16 = vadd.f32 %v1240_v11, %v1204_v20  ;;  %v3159_v8 = vmul.f32 %v2622_v38, %v2891_v52  ;;  %v3163_v63 = vmul.f32 %v2993_v35, %v2917_v21  ;;  %4778 = vst [vmem:[#allocation54_spill] sm:$0xff] %v3175_v50 }
 0x187   : > { %v3167_v20 = vmul.f32 %v3039_v10, %v2917_v21  ;;  %v899_v21 = vadd.s32 64, %v839_v60  ;;  %v3207_v50 = vmul.f32 %v2679_v3, %v2981_v33 }
 0x188   : > { %4770 = vst [vmem:[#allocation46_spill] sm:$0xff] %v3134_v51  ;;  %4771 = vst [vmem:[#allocation47_spill] sm:$0xff] %v3143_v16  ;;  %v3171_v51 = vsel %vm891_vm12, %v900_v46, %v846_v27  ;;  %v830_v16 = vand.u32 63, %v1998_v19  ;;  %v3189_v27 = vmul.f32 %v2620_v36, %v2818_v1  ;;  %v3193_v19 = vmul.f32 %v2993_v35, %v2968_v58 }
 0x189   : > { %4774 = vst [vmem:[#allocation50_spill] sm:$0xff] %v3159_v8  ;;  %4775 = vst [vmem:[#allocation51_spill] sm:$0xff] %v3163_v63  ;;  %v3169_v11 = vpop.permute.xlu0 %1062  ;;  %v3179_v8 = vmul.f32 %v3039_v10, %v2947_v14  ;;  %v3181_v12 = vpop.permute.xlu1 %926  ;;  %v3197_v46 = vmul.f32 %v3039_v10, %v2968_v58  ;;  %v3211_v1 = vmul.f32 %v2622_v38, %v2985_v43  ;;  %vm918_vm3 = vcmp.ge.s32.totalorder %v3171_v51, 1 }
 0x18a   : > { %4776 = vst [vmem:[#allocation52_spill] sm:$0xff] %v3167_v20  ;;  %4777 = vst [vmem:[#allocation53_spill] sm:$0xff] %v3169_v11  ;;  %v897_v20 = vadd.s32 64, %v825_v57  ;;  %v862_v63 = vsub.s32 0, %v2771_v6 }
 0x18b   : > { %4779 = vst [vmem:[#allocation55_spill] sm:$0xff] %v3179_v8  ;;  %4780 = vst [vmem:[#allocation56_spill] sm:$0xff] %v3181_v12  ;;  %v3201_v8 = vmul.f32 %v2620_v36, %v2981_v33 }
 0x18c   : > { %4783 = vst [vmem:[#allocation57_spill] sm:$0xff] %v3189_v27  ;;  %4784 = vst [vmem:[#allocation58_spill] sm:$0xff] %v3193_v19  ;;  %v3215_v27 = vmul.f32 %v3042_v44, %v2985_v43  ;;  %v3219_v19 = vmul.f32 %v2620_v36, %v3001_v42 }
 0x18d   : > { %4785 = vst [vmem:[#allocation59_spill] sm:$0xff] %v3197_v46  ;;  %4786 = vst [vmem:[#allocation60_spill] sm:$0xff] %v3201_v8  ;;  %v3224_v8 = vmul.f32 %v2679_v3, %v3001_v42  ;;  %v3234_v43 = vpop.permute.xlu0 %1082  ;;  %v3240_v46 = vpop.permute.xlu1 %946  ;;  %v3244_v3 = vsel %vm3183_vm1, %v899_v21, %v839_v60  ;;  %v3263_v60 = vmul.f32 %v2993_v35, %v2852_v59 }
 0x18e   : > { %4787 = vst [vmem:[#allocation61_spill] sm:$0xff] %v3207_v50  ;;  %4788 = vst [vmem:[#allocation62_spill] sm:$0xff] %v3211_v1  ;;  %v3228_v50 = vmul.f32 %v2622_v38, %v3014_v32  ;;  %v3232_v1 = vmul.f32 %v3042_v44, %v3014_v32  ;;  %v3283_v21 = vmul.f32 %v2993_v35, %v2813_v5  ;;  %vm4680_vm13 = vcmp.ge.s32.totalorder %v3244_v3, 1 }
 0x18f   : > { %4789 = vst [vmem:[#allocation63_spill] sm:$0xff] %v3215_v27  ;;  %4790 = vst [vmem:[#allocation64_spill] sm:$0xff] %v3219_v19  ;;  %v831_v27 = vsub.s32 0, %v830_v16  ;;  %v3238_v19 = vmul.f32 %v2622_v38, %v3024_v13 }
 0x190   : > { %4791 = vst [vmem:[#allocation65_spill] sm:$0xff] %v3224_v8  ;;  %4792 = vst [vmem:[#allocation66_spill] sm:$0xff] %v3228_v50  ;;  %v3246_v8 = vsel %vm888_vm2, %v897_v20, %v825_v57  ;;  %v3255_v50 = vmul.f32 %v3039_v10, %v2813_v5  ;;  %v3267_v57 = vmul.f32 %v2993_v35, %v2865_v15 }
 0x191   : > { %4793 = vst [vmem:[#allocation67_spill] sm:$0xff] %v3232_v1  ;;  %4794 = vst [vmem:[#allocation68_spill] sm:$0xff] %v3238_v19  ;;  %v3251_v1 = vmul.f32 %v3042_v44, %v3024_v13  ;;  %v3259_v19 = vmul.f32 %v2993_v35, %v2725_v24  ;;  %v3275_v10 = vmul.f32 %v2620_v36, %v2686_v7  ;;  %v3278_v24 = vpop.permute.xlu0 %932  ;;  %vm915_vm5 = vcmp.ge.s32.totalorder %v3246_v8, 1 }
 0x192   : > { %4798 = vst [vmem:[#allocation72_spill] sm:$0xff] %v3278_v24  ;;  %v832_v20 = vsel %vm826_vm4, %v831_v27, %v830_v16  ;;  %4799 = vst [vmem:[#allocation73_spill] sm:$0xff] %v3283_v21  ;;  %v1000_v11 = vsel %vm976_vm7, %v3181_v12, %v3278_v24  ;;  %v3298_v16 = vmul.f32 %v2620_v36, %v2791_v26  ;;  %vm1051_vm14 = vcmp.le.s32.totalorder %v3246_v8, 62 }
 0x193   : > { %4795 = vst [vmem:[#allocation69_spill] sm:$0xff] %v3251_v1  ;;  %4797 = vst [vmem:[#allocation71_spill] sm:$0xff] %v3275_v10  ;;  %v3287_v1 = vmul.f32 %v3042_v44, %v2905_v39  ;;  %v3294_v10 = vpop.permute.xlu1 %1068  ;;  %v3302_v27 = vmul.f32 %v3042_v44, %v2929_v61  ;;  %v3310_v21 = vsel %vm914_vm6, %v1000_v11, 0.0  ;;  %v3314_v12 = vmul.f32 %v2622_v38, %v2905_v39 }
 0x194   : > { %4801 = vst [vmem:[#allocation75_spill] sm:$0xff] %v3298_v16  ;;  %v3318_v24 = vmul.f32 %v2622_v38, %v2878_v22  ;;  %v3322_v16 = vmul.f32 %v2993_v35, %v2947_v14  ;;  %vm871_vm9 = vcmp.ne.s32.totalorder %v832_v20, 0  ;;  %v2003_v11 = vmin.u32 %v862_v63, %v2771_v6 }
 0x195   : > { %4800 = vst [vmem:[#allocation74_spill] sm:$0xff] %v3287_v1  ;;  %4802 = vst [vmem:[#allocation76_spill] sm:$0xff] %v3302_v27  ;;  %v3306_v1 = vmul.f32 %v3042_v44, %v2878_v22  ;;  %v1220_v44 = vmul.f32 %v2606_v29, %v3310_v21  ;;  %vm880_vm11 = vcmp.lt.s32.totalorder %v832_v20, 0  ;;  %v2001_v38 = vmin.u32 %v848_v18, %v2913_v54  ;;  %v4809_v29 = vld [vmem:[#allocation25_spill] sm:$0xff] }
 0x196   : > { %4804 = vst [vmem:[#allocation78_spill] sm:$0xff] %v3314_v12  ;;  %4805 = vst [vmem:[#allocation79_spill] sm:$0xff] %v3318_v24  ;;  %v3331_v12 = vpop.permute.xlu0 %952  ;;  %v855_v35 = vsub.s32 0, %v2939_v53  ;;  %v1241_v18 = vmul.f32 %v2943_v17, %v2852_v59  ;;  %v865_v59 = vand.u32 63, %v2003_v11  ;;  %vm854_vm4 = vcmp.lt.s32.totalorder %v2939_v53, 0 }
 0x197   : > { %4803 = vst [vmem:[#allocation77_spill] sm:$0xff] %v3306_v1  ;;  %4806 = vst [vmem:[#allocation80_spill] sm:$0xff] %v3322_v16  ;;  %v1546_v1 = vmul.f32 %v2648_v49, %v3310_v21  ;;  %v1256_v16 = vmul.f32 %v2610_v31, %v2832_v9  ;;  %v986_v63 = vsel %vm976_vm7, %v3240_v46, %v3331_v12  ;;  %v3344_v27 = vpop.permute.xlu1 %1088 }
 0x198   : > { %4807 = vst [vmem:[#allocation81_spill] sm:$0xff] %v3331_v12  ;;  %v3348_v49 = vmul.f32 %v2620_v36, %v4809_v29  ;;  %v3354_v9 = vsel %vm918_vm3, %v986_v63, 0.0  ;;  %vm889_vm12 = vmand %vm880_vm11, %vm871_vm9  ;;  %v1244_v63 = vmul.f32 %v2943_v17, %v2842_v4  ;;  %v3387_v4 = vmul.f32 %v2608_v30, %v2791_v26 }
 0x199   : > { %v3338_v24 = vadd.f32 %v3140_v56, %v1546_v1  ;;  %4811 = vst [vmem:[#allocation83_spill] sm:$0xff] %v3354_v9  ;;  %v898_v56 = vadd.s32 64, %v832_v20  ;;  %v3358_v1 = vmul.f32 %v2943_v17, %v2865_v15  ;;  %v1208_v12 = vmul.f32 %v2604_v28, %v3354_v9 }
 0x19a   : > { %4810 = vst [vmem:[#allocation25_spill] sm:$0xff] %v3348_v49  ;;  %v1534_v36 = vmul.f32 %v3026_v34, %v3354_v9  ;;  %v3371_v49 = vpop.permute.xlu0 %948  ;;  %v851_v15 = vand.u32 63, %v2001_v38  ;;  %4816 = vst [vmem:[#allocation88_spill] sm:$0xff] %v3387_v4  ;;  %v3391_v38 = vmul.f32 %v2610_v31, %v2905_v39  ;;  %v3406_v26 = vmul.f32 %v2943_v17, %v2813_v5 }
 0x19b   : > { %4808 = vst [vmem:[#allocation82_spill] sm:$0xff] %v3338_v24  ;;  %v3360_v24 = vadd.f32 %v1256_v16, %v1220_v44  ;;  %v2002_v16 = vmin.u32 %v855_v35, %v2939_v53  ;;  %v3376_v44 = vmul.f32 %v2608_v30, %v2686_v7  ;;  %v935_v11 = vpop.permute.xlu1 %934  ;;  %v3393_v35 = vadd.f32 %v1244_v63, %v1208_v12 }
 0x19c   : > { %v3383_v9 = vadd.f32 %v3125_v40, %v1534_v36  ;;  %v995_v7 = vsel %vm976_vm7, %v3090_v62, %v935_v11  ;;  %v3402_v40 = vmul.f32 %v2610_v31, %v2929_v61  ;;  %v4818_v36 = vld [vmem:[#allocation31_spill] sm:$0xff]  ;;  %v866_v63 = vsub.s32 0, %v865_v59 }
 0x19d   : > { %4812 = vst [vmem:[#allocation84_spill] sm:$0xff] %v3360_v24  ;;  %4813 = vst [vmem:[#allocation85_spill] sm:$0xff] %v3376_v44  ;;  %v3380_v24 = vmul.f32 %v2608_v30, %v2767_v0  ;;  %v3398_v0 = vsel %vm889_vm12, %v898_v56, %v832_v20  ;;  %v1360_v39 = vmul.f32 %v4818_v36, %v3115_v23  ;;  %v1024_v12 = vsel %vm915_vm5, %v995_v7, 0.0 }
 0x19e   : > { %4815 = vst [vmem:[#allocation87_spill] sm:$0xff] %v3383_v9  ;;  %4817 = vst [vmem:[#allocation89_spill] sm:$0xff] %v3393_v35  ;;  %v3414_v62 = vmul.f32 %v2943_v17, %v2947_v14  ;;  %v1205_v20 = vmul.f32 %v2604_v28, %v1024_v12  ;;  %v1531_v61 = vmul.f32 %v3026_v34, %v1024_v12  ;;  %v1071_v56 = vpop.permute.xlu0 %1070  ;;  %v852_v4 = vsub.s32 0, %v851_v15  ;;  %v4824_v9 = vld [vmem:[#allocation32_spill] sm:$0xff]  ;;  %v4893_v35 = vld [vmem:[#allocation74_spill] sm:$0xff] }
 0x19f   : > { %4814 = vst [vmem:[#allocation86_spill] sm:$0xff] %v3380_v24  ;;  %v858_v24 = vand.u32 63, %v2002_v16  ;;  %v1131_v5 = vsel %vm1112_vm10, %v3136_v55, %v1071_v56  ;;  %v3421_v23 = vpop.permute.xlu1 %1084  ;;  %v3428_v14 = vmul.f32 %v2608_v30, %v2729_v25  ;;  %vm4681_vm1 = vcmp.ge.s32.totalorder %v3398_v0, 1 }
 0x1a0   : > { %4819 = vst [vmem:[#allocation31_spill] sm:$0xff] %v3414_v62  ;;  %v3431_v7 = vadd.f32 %v3132_v48, %v1531_v61  ;;  %v3435_v16 = vsel %vm1050_vm8, %v1131_v5, 0.0  ;;  %v3438_v44 = vadd.f32 %v1241_v18, %v1205_v20  ;;  %v1426_v54 = vadd.f32 %v3259_v19, %v1360_v39 }
 0x1a1   : > { %4820 = vst [vmem:[#allocation90_spill] sm:$0xff] %v3428_v14  ;;  %4822 = vst [vmem:[#allocation92_spill] sm:$0xff] %v3435_v16  ;;  %v1465_v6 = vmul.f32 %v4824_v9, %v3435_v16  ;;  %vm4688_vm2 = vcmp.le.s32.totalorder %v3398_v0, 62  ;;  %v3446_v25 = vmul.f32 %v2608_v30, %v4809_v29  ;;  %v3448_v61 = vsel %vm861_vm15, %v866_v63, %v865_v59  ;;  %v4829_v63 = vld [vmem:[#allocation44_spill] sm:$0xff]  ;;  %v4845_v14 = vld [vmem:[#allocation21_spill] sm:$0xff] }
 0x1a2   : > { %4821 = vst [vmem:[#allocation91_spill] sm:$0xff] %v3431_v7  ;;  %4823 = vst [vmem:[#allocation93_spill] sm:$0xff] %v3438_v44  ;;  %v941_v48 = vpop.permute.xlu0 %940  ;;  %v3450_v5 = vsel %vm847_vm0, %v852_v4, %v851_v15  ;;  %v859_v7 = vsub.s32 0, %v858_v24  ;;  %v3454_v18 = vmul.f32 %v2943_v17, %v2968_v58  ;;  %vm1049_vm9 = vcmp.le.s32.totalorder %v3084_v37, 62 }
 0x1a3   : > { %4825 = vst [vmem:[#allocation32_spill] sm:$0xff] %v3446_v25  ;;  %v989_v19 = vsel %vm976_vm7, %v941_v48, %v3240_v46  ;;  %v992_v39 = vsel %vm976_vm7, %v935_v11, %v941_v48  ;;  %v3461_v20 = vpop.permute.xlu1 %954  ;;  %v1492_v29 = vadd.f32 %v1465_v6, %v1426_v54  ;;  %v3473_v17 = vmul.f32 %v2610_v31, %v2878_v22  ;;  %v4830_v6 = vld [vmem:[#allocation33_spill] sm:$0xff] }
 0x1a4   : > { %4826 = vst [vmem:[#allocation94_spill] sm:$0xff] %v3454_v18  ;;  %v1025_v59 = vsel %vm4681_vm1, %v992_v39, 0.0  ;;  %v3469_v58 = vsel %vm4680_vm13, %v989_v19, 0.0  ;;  %v3477_v46 = vmul.f32 %v2608_v30, %v2981_v33  ;;  %vm876_vm11 = vcmp.ne.s32.totalorder %v3448_v61, 0 }
 0x1a5   : > { %4827 = vst [vmem:[#allocation95_spill] sm:$0xff] %v3473_v17  ;;  %1680 = vrot.lane.b32.xlu1 %v1492_v29, %s2332_s6  ;;  %vm885_vm12 = vcmp.lt.s32.totalorder %v3448_v61, 0  ;;  %v903_v15 = vadd.s32 64, %v3448_v61  ;;  %vm874_vm15 = vcmp.ne.s32.totalorder %v3450_v5, 0  ;;  %v1532_v11 = vmul.f32 %v3026_v34, %v1025_v59 }
 0x1a6   : > { %4828 = vst [vmem:[#allocation96_spill] sm:$0xff] %v3477_v46  ;;  %v1533_v22 = vmul.f32 %v3026_v34, %v3469_v58  ;;  %v3487_v4 = vpop.permute.xlu0 %1090  ;;  %vm883_vm0 = vcmp.lt.s32.totalorder %v3450_v5, 0  ;;  %v860_v33 = vsel %vm854_vm4, %v859_v7, %v858_v24  ;;  %v999_v54 = vsel %vm976_vm7, %v4830_v6, %v4829_v63  ;;  %v4844_v46 = vld [vmem:[#allocation17_spill] sm:$0xff] }
 0x1a7   : > { %v1361_v48 = vmul.f32 %v4818_v36, %v1024_v12  ;;  %v1206_v19 = vmul.f32 %v2604_v28, %v1025_v59  ;;  %v1362_v39 = vmul.f32 %v4818_v36, %v1025_v59  ;;  %v1077_v29 = vpop.permute.xlu1 %1076  ;;  %vm1053_vm13 = vcmp.le.s32.totalorder %v3244_v3, 62 }
 0x1a8   : > { %v1207_v44 = vmul.f32 %v2604_v28, %v3469_v58  ;;  %v3503_v53 = vadd.f32 %v3151_v47, %v1532_v11  ;;  %v3506_v24 = vadd.f32 %v3255_v50, %v1533_v22  ;;  %v1125_v12 = vsel %vm1112_vm10, %v1077_v29, %v3234_v43 }
 0x1a9   : > { %v1128_v7 = vsel %vm1112_vm10, %v1071_v56, %v1077_v29  ;;  %v901_v59 = vadd.s32 64, %v3450_v5  ;;  %vm875_vm4 = vcmp.ne.s32.totalorder %v860_v33, 0  ;;  %vm884_vm1 = vcmp.lt.s32.totalorder %v860_v33, 0 }
 0x1aa   : > { %4831 = vst [vmem:[#allocation44_spill] sm:$0xff] %v3503_v53  ;;  %4832 = vst [vmem:[#allocation33_spill] sm:$0xff] %v3506_v24  ;;  %v3516_v16 = vsel %vm914_vm6, %v999_v54, 0.0  ;;  %v3520_v47 = vsel %vm1051_vm14, %v1128_v7, 0.0  ;;  %v3524_v50 = vsel %vm4688_vm2, %v1125_v12, 0.0  ;;  %v937_v11 = vpop.permute.xlu0 %936  ;;  %v902_v22 = vadd.s32 64, %v860_v33 }
 0x1ab   : > { %4833 = vst [vmem:[#allocation97_spill] sm:$0xff] %v3516_v16  ;;  %4834 = vst [vmem:[#allocation98_spill] sm:$0xff] %v3520_v47  ;;  %v1466_v56 = vmul.f32 %v4824_v9, %v3520_v47  ;;  %v1467_v29 = vmul.f32 %v4824_v9, %v3524_v50  ;;  %v3530_v24 = vpop.permute.xlu1 %950  ;;  %v1427_v54 = vadd.f32 %v3263_v60, %v1361_v48  ;;  %v4838_v7 = vld [vmem:[#allocation36_spill] sm:$0xff] }
 0x1ac   : > { %4835 = vst [vmem:[#allocation99_spill] sm:$0xff] %v3524_v50  ;;  %v1428_v53 = vadd.f32 %v3267_v57, %v1362_v39  ;;  %vm3538_vm6 = vmand %vm885_vm12, %vm876_vm11  ;;  %v1135_v47 = vsel %vm1112_vm10, %v4838_v7, %v3127_v2  ;;  %v4839_v50 = vld [vmem:[#allocation35_spill] sm:$0xff]  ;;  %v3559_v48 = vadd.f32 %v3358_v1, %v1206_v19  ;;  %v3562_v39 = vadd.f32 %v3406_v26, %v1207_v44 }
 0x1ad   : > { %v1134_v60 = vsel %vm1112_vm10, %v4839_v50, %v3136_v55  ;;  %vm3554_vm2 = vmand %vm883_vm0, %vm874_vm15  ;;  %v1369_v25 = vmul.f32 %v4844_v46, %v3516_v16  ;;  %v1538_v55 = vmul.f32 %v4845_v14, %v3516_v16  ;;  %v1493_v17 = vadd.f32 %v1466_v56, %v1427_v54 }
 0x1ae   : > { %4842 = vst [vmem:[#allocation35_spill] sm:$0xff] %v3559_v48  ;;  %4843 = vst [vmem:[#allocation100_spill] sm:$0xff] %v3562_v39  ;;  %v1494_v18 = vadd.f32 %v1467_v29, %v1428_v53  ;;  %v3568_v62 = vpop.permute.xlu0 %1086  ;;  %v3578_v1 = vmul.f32 %v2608_v30, %v3001_v42  ;;  %v3582_v44 = vmul.f32 %v2610_v31, %v2891_v52  ;;  %v1167_v53 = vsel %vm1049_vm9, %v1135_v47, 0.0 }
 0x1af   : > { %vm3572_vm11 = vmand %vm884_vm1, %vm875_vm4  ;;  %v3586_v26 = vmul.f32 %v2610_v31, %v3014_v32  ;;  %v3590_v19 = vmul.f32 %v2610_v31, %v3024_v13  ;;  %v1158_v56 = vsel %vm1049_vm9, %v1134_v60, 0.0  ;;  %1686 = vrot.lane.b32.xlu0 %v1493_v17, %s2332_s6  ;;  %v1073_v30 = vpop.permute.xlu1 %1072  ;;  %v3601_v32 = vsel %vm3538_vm6, %v903_v15, %v3448_v61  ;;  %v4854_v15 = vld [vmem:[#allocation71_spill] sm:$0xff] }
 0x1b0   : > { %4848 = vst [vmem:[#allocation17_spill] sm:$0xff] %v3578_v1  ;;  %1692 = vrot.lane.b32.xlu1 %v1494_v18, %s2332_s6  ;;  %v3606_v31 = vsel %vm3554_vm2, %v901_v59, %v3450_v5  ;;  %v1122_v13 = vsel %vm1112_vm10, %v3234_v43, %v3344_v27  ;;  %v1363_v52 = vmul.f32 %v4818_v36, %v3469_v58  ;;  %v4851_v18 = vld [vmem:[#allocation23_spill] sm:$0xff]  ;;  %v4864_v1 = vld [vmem:[#allocation22_spill] sm:$0xff]  ;;  %vm4865_vm1 = vcmp.ge.s32.totalorder %v3398_v0, 1 }
 0x1b1   : > { %4849 = vst [vmem:[#allocation21_spill] sm:$0xff] %v3586_v26  ;;  %4850 = vst [vmem:[#allocation101_spill] sm:$0xff] %v3590_v19  ;;  %v996_v42 = vsel %vm976_vm7, %v4829_v63, %v937_v11  ;;  %v1132_v61 = vsel %vm1112_vm10, %v3127_v2, %v1073_v30  ;;  %v3621_v17 = vadd.f32 %v4851_v18, %v1538_v55  ;;  %v4855_v59 = vld [vmem:[#allocation15_spill] sm:$0xff]  ;;  %v4858_v2 = vld [vmem:[#allocation30_spill] sm:$0xff]  ;;  %vm913_vm2 = vcmp.ge.s32.totalorder %v3084_v37, 1 }
 0x1b2   : > { %v3625_v5 = vsel %vm1050_vm8, %v1132_v61, 0.0  ;;  %v1435_v43 = vadd.f32 %v4854_v15, %v1369_v25  ;;  %v3630_v58 = vsel %vm3572_vm11, %v902_v22, %v860_v33  ;;  %v3633_v47 = vmul.f32 %v4855_v59, %v1167_v53  ;;  %v4857_v63 = vld [vmem:[#allocation19_spill] sm:$0xff]  ;;  %v3643_v60 = vpop.permute.xlu0 %956  ;;  %v4860_v25 = vld [vmem:[#allocation53_spill] sm:$0xff]  ;;  %vm4898_vm15 = vmmov %vm4865_vm1 }
 0x1b3   : > { %4852 = vst [vmem:[#allocation23_spill] sm:$0xff] %v3621_v17  ;;  %4853 = vst [vmem:[#allocation102_spill] sm:$0xff] %v3625_v5  ;;  %v3636_v29 = vmul.f32 %v4857_v63, %v1167_v53  ;;  %v3639_v54 = vmul.f32 %v4858_v2, %v1158_v56  ;;  %v1474_v12 = vmul.f32 %v4857_v63, %v3625_v5  ;;  %v3651_v22 = vsel %vm1053_vm13, %v1122_v13, 0.0  ;;  %v943_v55 = vpop.permute.xlu1 %942  ;;  %v4862_v13 = vld [vmem:[#allocation73_spill] sm:$0xff] }
 0x1b4   : > { %4856 = vst [vmem:[#allocation71_spill] sm:$0xff] %v3633_v47  ;;  %4859 = vst [vmem:[#allocation19_spill] sm:$0xff] %v3643_v60  ;;  %v1136_v33 = vsel %vm1112_vm10, %v4860_v25, %v3294_v10  ;;  %v3655_v7 = vsel %vm915_vm5, %v996_v42, 0.0  ;;  %v988_v57 = vsel %vm976_vm7, %v3530_v24, %v3643_v60  ;;  %v993_v61 = vsel %vm976_vm7, %v937_v11, %v943_v55  ;;  %v4863_v42 = vld [vmem:[#allocation18_spill] sm:$0xff]  ;;  %v4882_v25 = vld [vmem:[#allocation16_spill] sm:$0xff] }
 0x1b5   : > { %4861 = vst [vmem:[#allocation30_spill] sm:$0xff] %v3651_v22  ;;  %v3663_v53 = vsel %vm918_vm3, %v988_v57, 0.0  ;;  %v1501_v18 = vadd.f32 %v1474_v12, %v1435_v43  ;;  %v1429_v15 = vadd.f32 %v4862_v13, %v1363_v52  ;;  %v3669_v39 = vmul.f32 %v4824_v9, %v1158_v56 }
 0x1b6   : > { %v1378_v48 = vmul.f32 %v4863_v42, %v3310_v21  ;;  %v1550_v19 = vmul.f32 %v4864_v1, %v3663_v53  ;;  %v3677_v47 = vsel %vm4865_vm1, %v993_v61, 0.0  ;;  %v1468_v57 = vmul.f32 %v4824_v9, %v3651_v22  ;;  %v1079_v52 = vpop.permute.xlu0 %1078  ;;  %v4867_v61 = vld [vmem:[#allocation70_spill] sm:$0xff] }
 0x1b7   : > { %4866 = vst [vmem:[#allocation73_spill] sm:$0xff] %v3677_v47  ;;  %v1370_v11 = vmul.f32 %v4844_v46, %v3655_v7  ;;  %v990_v56 = vsel %vm976_vm7, %v943_v55, %v3371_v49  ;;  %v1540_v21 = vmul.f32 %v4845_v14, %v3677_v47  ;;  %1682 = vrot.lane.b32.xlu0 %v1501_v18, %s2332_s6  ;;  %v1176_v43 = vsel %vm1049_vm9, %v1136_v33, 0.0  ;;  %v3701_v22 = vpop.permute.xlu1 %1092  ;;  %v4869_v18 = vld [vmem:[#allocation28_spill] sm:$0xff] }
 0x1b8   : > { %v987_v12 = vsel %vm976_vm7, %v3371_v49, %v3461_v20  ;;  %v3697_v13 = vadd.f32 %v4867_v61, %v1550_v19  ;;  %v1371_v55 = vmul.f32 %v4844_v46, %v3677_v47  ;;  %v1126_v33 = vsel %vm1112_vm10, %v1079_v52, %v3421_v23  ;;  %v4871_v49 = vld [vmem:[#allocation43_spill] sm:$0xff]  ;;  %v4877_v47 = vld [vmem:[#allocation14_spill] sm:$0xff] }
 0x1b9   : > { %v3704_v16 = vadd.f32 %v4869_v18, %v1540_v21  ;;  %v1129_v26 = vsel %vm1112_vm10, %v1073_v30, %v1079_v52  ;;  %v1495_v17 = vadd.f32 %v1468_v57, %v1429_v15  ;;  %v1444_v60 = vadd.f32 %v4871_v49, %v1378_v48  ;;  %v4876_v18 = vld [vmem:[#allocation49_spill] sm:$0xff]  ;;  %v4880_v49 = vld [vmem:[#allocation75_spill] sm:$0xff] }
 0x1ba   : > { %4868 = vst [vmem:[#allocation18_spill] sm:$0xff] %v3697_v13  ;;  %vm4872_vm9 = vcmp.ge.s32.totalorder %v3244_v3, 1  ;;  %v3718_v61 = vsel %vm1051_vm14, %v1129_v26, 0.0  ;;  %vm4874_vm12 = vcmp.le.s32.totalorder %v3398_v0, 62  ;;  %v1436_v13 = vadd.f32 %v4876_v18, %v1370_v11  ;;  %v1075_v57 = vpop.permute.xlu0 %1074  ;;  %v4878_v26 = vld [vmem:[#allocation83_spill] sm:$0xff] }
 0x1bb   : > { %4870 = vst [vmem:[#allocation70_spill] sm:$0xff] %v3704_v16  ;;  %v3714_v19 = vsel %vm4872_vm9, %v990_v56, 0.0  ;;  %4873 = vst [vmem:[#allocation28_spill] sm:$0xff] %v3718_v61  ;;  %v3722_v21 = vsel %vm4874_vm12, %v1126_v33, 0.0  ;;  %v1224_v30 = vmul.f32 %v4877_v47, %v3663_v53  ;;  %v1475_v48 = vmul.f32 %v4857_v63, %v3718_v61  ;;  %1698 = vrot.lane.b32.xlu0 %v1495_v17, %s2332_s6  ;;  %v939_v33 = vpop.permute.xlu1 %938 }
 0x1bc   : > { %4875 = vst [vmem:[#allocation43_spill] sm:$0xff] %v3722_v21  ;;  %v1476_v15 = vmul.f32 %v4857_v63, %v3722_v21  ;;  %v1364_v56 = vmul.f32 %v4818_v36, %v4878_v26  ;;  %v3736_v52 = vsel %vm918_vm3, %v987_v12, 0.0  ;;  %v1133_v11 = vsel %vm1112_vm10, %v3294_v10, %v1075_v57  ;;  %v4883_v10 = vld [vmem:[#allocation20_spill] sm:$0xff]  ;;  %vm4899_vm0 = vmmov %vm4872_vm9 }
 0x1bd   : > { %4879 = vst [vmem:[#allocation49_spill] sm:$0xff] %v3736_v52  ;;  %v1437_v18 = vadd.f32 %v4880_v49, %v1371_v55  ;;  %v1123_v17 = vsel %vm1112_vm10, %v3421_v23, %v3487_v4  ;;  %v1372_v16 = vmul.f32 %v4844_v46, %v3714_v19  ;;  %v1502_v26 = vadd.f32 %v1475_v48, %v1436_v13  ;;  %v4884_v55 = vld [vmem:[#allocation72_spill] sm:$0xff]  ;;  %vm4902_vm11 = vmmov %vm4874_vm12 }
 0x1be   : > { %v3750_v12 = vsel %vm1050_vm8, %v1133_v11, 0.0  ;;  %v997_v49 = vsel %vm976_vm7, %v4884_v55, %v939_v33  ;;  %vm1057_vm3 = vcmp.le.s32.totalorder %v3601_v32, 62  ;;  %v3761_v23 = vmul.f32 %v4882_v25, %v1176_v43  ;;  %v3768_v48 = vpop.permute.xlu0 %1106 }
 0x1bf   : > { %4881 = vst [vmem:[#allocation14_spill] sm:$0xff] %v3750_v12  ;;  %v1316_v21 = vmul.f32 %v4882_v25, %v3750_v12  ;;  %v1483_v61 = vmul.f32 %v4883_v10, %v3750_v12  ;;  %v1503_v59 = vadd.f32 %v1476_v15, %v1437_v18  ;;  %v1542_v45 = vmul.f32 %v4845_v14, %v3736_v52 }
 0x1c0   : > { %4885 = vst [vmem:[#allocation83_spill] sm:$0xff] %v3761_v23  ;;  %v1042_v13 = vsel %vm915_vm5, %v997_v49, 0.0  ;;  %1688 = vrot.lane.b32.xlu1 %v1502_v26, %s2332_s6  ;;  %v3771_v11 = vadd.f32 %v3582_v44, %v1224_v30  ;;  %v3775_v15 = vsel %vm1053_vm13, %v1123_v17, 0.0  ;;  %v3780_v23 = vpop.permute.xlu1 %970  ;;  %vm919_vm5 = vcmp.ge.s32.totalorder %v3606_v31, 1  ;;  %v4888_v44 = vld [vmem:[#allocation48_spill] sm:$0xff]  ;;  %v4889_v49 = vld [vmem:[#allocation34_spill] sm:$0xff] }
 0x1c1   : > { %4887 = vst [vmem:[#allocation16_spill] sm:$0xff] %v3775_v15  ;;  %v1510_v18 = vadd.f32 %v1483_v61, %v1444_v60  ;;  %v1221_v55 = vmul.f32 %v4877_v47, %v1042_v13  ;;  %v1547_v12 = vmul.f32 %v4864_v1, %v1042_v13  ;;  %1694 = vrot.lane.b32.xlu0 %v1503_v59, %s2332_s6  ;;  %v4890_v61 = vld [vmem:[#allocation84_spill] sm:$0xff]  ;;  %vm1054_vm8 = vcmp.le.s32.totalorder %v3171_v51, 62 }
 0x1c2   : > { %4886 = vst [vmem:[#allocation75_spill] sm:$0xff] %v3771_v11  ;;  %v3784_v26 = vmul.f32 %v4883_v10, %v1176_v43  ;;  %v1438_v30 = vadd.f32 %v4888_v44, %v1372_v16  ;;  %v1001_v60 = vsel %vm976_vm7, %v3780_v23, %v4889_v49  ;;  %v3792_v17 = vadd.f32 %v1316_v21, %v4890_v61  ;;  %v4892_v11 = vld [vmem:[#allocation45_spill] sm:$0xff] }
 0x1c3   : > { %v3795_v5 = vadd.f32 %v4892_v11, %v1364_v56  ;;  %v3799_v59 = vmul.f32 %v4844_v46, %v3736_v52  ;;  %v3802_v43 = vadd.f32 %v4893_v35, %v1547_v12  ;;  %v1022_v16 = vsel %vm913_vm2, %v1001_v60, 0.0  ;;  %v945_v56 = vpop.permute.xlu0 %944  ;;  %v4895_v35 = vld [vmem:[#allocation26_spill] sm:$0xff] }
 0x1c4   : > { %4891 = vst [vmem:[#allocation20_spill] sm:$0xff] %v3792_v17  ;;  %v1477_v44 = vmul.f32 %v4857_v63, %v3775_v15  ;;  %v1203_v49 = vmul.f32 %v2604_v28, %v1022_v16  ;;  %v1359_v21 = vmul.f32 %v4818_v36, %v1022_v16  ;;  %1684 = vrot.lane.b32.xlu1 %v1510_v18, %s2332_s6  ;;  %v1081_v16 = vpop.permute.xlu1 %1080  ;;  %v4897_v17 = vld [vmem:[#allocation37_spill] sm:$0xff]  ;;  %vm920_vm4 = vcmp.ge.s32.totalorder %v3630_v58, 1  ;;  %v4911_v15 = vld [vmem:[#allocation40_spill] sm:$0xff] }
 0x1c5   : > { %4894 = vst [vmem:[#allocation72_spill] sm:$0xff] %v3802_v43  ;;  %v3813_v11 = vadd.f32 %v3391_v38, %v1221_v55  ;;  %v3816_v12 = vadd.f32 %v4895_v35, %v1542_v45  ;;  %v1124_v60 = vsel %vm1112_vm10, %v3568_v62, %v3701_v22  ;;  %v991_v61 = vsel %vm976_vm7, %v945_v56, %v3530_v24 }
 0x1c6   : > { %v994_v18 = vsel %vm976_vm7, %v939_v33, %v945_v56  ;;  %v1263_v52 = vadd.f32 %v4897_v17, %v1203_v49  ;;  %v3832_v45 = vsel %vm4899_vm0, %v991_v61, 0.0  ;;  %v1504_v55 = vadd.f32 %v1477_v44, %v1438_v30  ;;  %v4901_v49 = vld [vmem:[#allocation54_spill] sm:$0xff] }
 0x1c7   : > { %4896 = vst [vmem:[#allocation48_spill] sm:$0xff] %v3816_v12  ;;  %v1043_v38 = vsel %vm4898_vm15, %v994_v18, 0.0  ;;  %v1379_v35 = vmul.f32 %v4863_v42, %v1042_v13  ;;  %v1137_v24 = vsel %vm1112_vm10, %v3768_v48, %v4839_v50  ;;  %v4900_v12 = vld [vmem:[#allocation38_spill] sm:$0xff]  ;;  %vm921_vm6 = vcmp.ge.s32.totalorder %v3601_v32, 1  ;;  %v3852_v44 = vpop.permute.xlu0 %972 }
 0x1c8   : > { %v1425_v33 = vadd.f32 %v4900_v12, %v1359_v21  ;;  %v1380_v56 = vmul.f32 %v4863_v42, %v1043_v38  ;;  %v1548_v17 = vmul.f32 %v4864_v1, %v1043_v38  ;;  %v1549_v30 = vmul.f32 %v4864_v1, %v3832_v45  ;;  %1700 = vrot.lane.b32.xlu1 %v1504_v55, %s2332_s6  ;;  %v4906_v55 = vld [vmem:[#allocation77_spill] sm:$0xff]  ;;  %v4948_v32 = vld [vmem:[#allocation94_spill] sm:$0xff] }
 0x1c9   : > { %v1127_v13 = vsel %vm1112_vm10, %v1081_v16, %v3568_v62  ;;  %v1130_v50 = vsel %vm1112_vm10, %v1075_v57, %v1081_v16  ;;  %v1002_v62 = vsel %vm976_vm7, %v3852_v44, %v4830_v6  ;;  %v959_v57 = vpop.permute.xlu1 %958  ;;  %vm1056_vm1 = vcmp.le.s32.totalorder %v3630_v58, 62  ;;  %v4904_v16 = vld [vmem:[#allocation76_spill] sm:$0xff] }
 0x1ca   : > { %v1446_v21 = vadd.f32 %v4901_v49, %v1380_v56  ;;  %v3857_v12 = vsel %vm1051_vm14, %v1130_v50, 0.0  ;;  %v3861_v61 = vsel %vm4902_vm11, %v1127_v13, 0.0  ;;  %v3870_v18 = vsel %vm1053_vm13, %v1124_v60, 0.0 }
 0x1cb   : > { %v3874_v8 = vsel %vm1057_vm3, %v1137_v24, 0.0  ;;  %v3877_v0 = vadd.f32 %v4904_v16, %v1548_v17  ;;  %v3880_v56 = vadd.f32 %v4906_v55, %v1549_v30  ;;  %vm1055_vm14 = vcmp.le.s32.totalorder %v3606_v31, 62  ;;  %v4909_v24 = vld [vmem:[#allocation81_spill] sm:$0xff]  ;;  %v1095_v16 = vpop.permute.xlu0 %1094 }
 0x1cc   : > { %4903 = vst [vmem:[#allocation34_spill] sm:$0xff] %v3874_v8  ;;  %v1381_v6 = vmul.f32 %v4863_v42, %v3832_v45  ;;  %v1485_v3 = vmul.f32 %v4883_v10, %v3861_v61  ;;  %v3889_v60 = vsel %vm913_vm2, %v1002_v62, 0.0  ;;  %v983_v17 = vsel %vm976_vm7, %v4909_v24, %v959_v57 }
 0x1cd   : > { %4905 = vst [vmem:[#allocation84_spill] sm:$0xff] %v3877_v0  ;;  %4907 = vst [vmem:[#allocation45_spill] sm:$0xff] %v3880_v56  ;;  %v1484_v30 = vmul.f32 %v4883_v10, %v3857_v12  ;;  %v1368_v13 = vmul.f32 %v4844_v46, %v3889_v60  ;;  %v3900_v50 = vsel %vm919_vm5, %v983_v17, 0.0  ;;  %v1491_v49 = vadd.f32 %v3669_v39, %v1425_v33  ;;  %v3907_v56 = vpop.permute.xlu1 %1108  ;;  %v4910_v0 = vld [vmem:[#allocation78_spill] sm:$0xff] }
 0x1ce   : > { %4908 = vst [vmem:[#allocation74_spill] sm:$0xff] %v3889_v60  ;;  %v1486_v62 = vmul.f32 %v4883_v10, %v3870_v18  ;;  %v1512_v55 = vadd.f32 %v1485_v3, %v1446_v21  ;;  %v1535_v24 = vmul.f32 %v3026_v34, %v3900_v50  ;;  %v1445_v43 = vadd.f32 %v4910_v0, %v1379_v35  ;;  %v4912_v21 = vld [vmem:[#allocation55_spill] sm:$0xff] }
 0x1cf   : > { %v1472_v60 = vmul.f32 %v4824_v9, %v3874_v8  ;;  %v1222_v17 = vmul.f32 %v4877_v47, %v1043_v38  ;;  %v1434_v1 = vadd.f32 %v4911_v15, %v1368_v13  ;;  %1674 = vrot.lane.b32.xlu0 %v1491_v49, %s2332_s6  ;;  %v1119_v39 = vsel %vm1112_vm10, %v3344_v27, %v1095_v16  ;;  %v4913_v38 = vld [vmem:[#allocation79_spill] sm:$0xff]  ;;  %v965_v49 = vpop.permute.xlu0 %964 }
 0x1d0   : > { %v1317_v33 = vmul.f32 %v4882_v25, %v3857_v12  ;;  %v3921_v3 = vadd.f32 %v4912_v21, %v1535_v24  ;;  %v3925_v35 = vsel %vm1054_vm8, %v1119_v39, 0.0  ;;  %1696 = vrot.lane.b32.xlu1 %v1512_v55, %s2332_s6  ;;  %v1447_v15 = vadd.f32 %v4913_v38, %v1381_v6 }
 0x1d1   : > { %v1318_v0 = vmul.f32 %v4882_v25, %v3861_v61  ;;  %v1469_v27 = vmul.f32 %v4824_v9, %v3925_v35  ;;  %v1511_v13 = vadd.f32 %v1484_v30, %v1445_v43  ;;  %v1500_v8 = vadd.f32 %v3636_v29, %v1434_v1  ;;  %v1101_v55 = vpop.permute.xlu1 %1100 }
 0x1d2   : > { %v1365_v24 = vmul.f32 %v4818_v36, %v3900_v50  ;;  %v977_v39 = vsel %vm976_vm7, %v965_v49, %v3780_v23  ;;  %v980_v6 = vsel %vm976_vm7, %v959_v57, %v965_v49  ;;  %v3942_v21 = vadd.f32 %v3639_v54, %v1263_v52  ;;  %v4916_v49 = vld [vmem:[#allocation51_spill] sm:$0xff] }
 0x1d3   : > { %v1496_v38 = vadd.f32 %v1469_v27, %v3795_v5  ;;  %1690 = vrot.lane.b32.xlu0 %v1511_v13, %s2332_s6  ;;  %v3948_v1 = vsel %vm920_vm4, %v980_v6, 0.0  ;;  %v1030_v29 = vsel %vm921_vm6, %v977_v39, 0.0  ;;  %v1113_v23 = vsel %vm1112_vm10, %v1101_v55, %v3768_v48  ;;  %v961_v48 = vpop.permute.xlu0 %960  ;;  %v4918_v6 = vld [vmem:[#allocation58_spill] sm:$0xff] }
 0x1d4   : > { %4914 = vst [vmem:[#allocation26_spill] sm:$0xff] %v3942_v21  ;;  %v1366_v43 = vmul.f32 %v4818_v36, %v3948_v1  ;;  %v1367_v54 = vmul.f32 %v4818_v36, %v1030_v29  ;;  %v1536_v5 = vmul.f32 %v3026_v34, %v3948_v1  ;;  %v1513_v52 = vadd.f32 %v1486_v62, %v1447_v15  ;;  %v4917_v15 = vld [vmem:[#allocation59_spill] sm:$0xff] }
 0x1d5   : > { %v1537_v57 = vmul.f32 %v3026_v34, %v1030_v29  ;;  %v1116_v30 = vsel %vm1112_vm10, %v1095_v16, %v1101_v55  ;;  %v3965_v27 = vsel %vm1056_vm1, %v1113_v23, 0.0  ;;  %1704 = vrot.lane.b32.xlu1 %v1496_v38, %s2332_s6  ;;  %v3969_v13 = vadd.f32 %v1317_v33, %v3813_v11  ;;  %v3981_v39 = vpop.permute.xlu1 %974  ;;  %v4919_v38 = vld [vmem:[#allocation52_spill] sm:$0xff] }
 0x1d6   : > { %v1304_v36 = vmul.f32 %v4858_v2, %v3925_v35  ;;  %v1433_v62 = vadd.f32 %v4916_v49, %v1367_v54  ;;  %v3975_v34 = vadd.f32 %v4917_v15, %v1536_v5  ;;  %v3979_v16 = vsel %vm1055_vm14, %v1116_v30, 0.0  ;;  %v4921_v33 = vld [vmem:[#allocation80_spill] sm:$0xff] }
 0x1d7   : > { %4915 = vst [vmem:[#allocation37_spill] sm:$0xff] %v3969_v13  ;;  %v1432_v55 = vadd.f32 %v4918_v6, %v1366_v43  ;;  %v3985_v29 = vadd.f32 %v4919_v38, %v1537_v57  ;;  %v1470_v11 = vmul.f32 %v4824_v9, %v3979_v16  ;;  %1702 = vrot.lane.b32.xlu0 %v1513_v52, %s2332_s6  ;;  %v4922_v30 = vld [vmem:[#allocation56_spill] sm:$0xff]  ;;  %v4009_v52 = vpop.permute.xlu0 %1110 }
 0x1d8   : > { %v1431_v23 = vadd.f32 %v4921_v33, %v1365_v24  ;;  %v1471_v54 = vmul.f32 %v4824_v9, %v3965_v27  ;;  %v984_v5 = vsel %vm976_vm7, %v3461_v20, %v961_v48  ;;  %v1003_v43 = vsel %vm976_vm7, %v3981_v39, %v4922_v30  ;;  %v4924_v33 = vld [vmem:[#allocation61_spill] sm:$0xff] }
 0x1d9   : > { %4920 = vst [vmem:[#allocation38_spill] sm:$0xff] %v3985_v29  ;;  %v4000_v57 = vadd.f32 %v1472_v60, %v1433_v62  ;;  %v4004_v49 = vsel %vm919_vm5, %v984_v5, 0.0  ;;  %v1040_v24 = vsel %vm913_vm2, %v1003_v43, 0.0  ;;  %1676 = vrot.lane.b32.xlu1 %v1500_v8, %s2332_s6  ;;  %v1282_v20 = vadd.f32 %v3402_v40, %v1222_v17  ;;  %v1097_v37 = vpop.permute.xlu1 %1096  ;;  %v4926_v5 = vld [vmem:[#allocation42_spill] sm:$0xff] }
 0x1da   : > { %v1497_v9 = vadd.f32 %v1470_v11, %v1431_v23  ;;  %v1539_v15 = vmul.f32 %v4845_v14, %v3655_v7  ;;  %v1382_v60 = vmul.f32 %v4863_v42, %v3663_v53  ;;  %v1543_v62 = vmul.f32 %v4845_v14, %v4004_v49 }
 0x1db   : > { %v1219_v6 = vmul.f32 %v4877_v47, %v1040_v24  ;;  %v1498_v38 = vadd.f32 %v1471_v54, %v1432_v55  ;;  %v1377_v8 = vmul.f32 %v4863_v42, %v1040_v24  ;;  %v1120_v40 = vsel %vm1112_vm10, %v3487_v4, %v1097_v37  ;;  %v4925_v55 = vld [vmem:[#allocation41_spill] sm:$0xff]  ;;  %v1103_v4 = vpop.permute.xlu0 %1102 }
 0x1dc   : > { %1710 = vrot.lane.b32.xlu0 %v1497_v9, %s2332_s6  ;;  %v4024_v17 = vadd.f32 %v1318_v0, %v1282_v20  ;;  %v1541_v53 = vmul.f32 %v4845_v14, %v3714_v19  ;;  %v1374_v11 = vmul.f32 %v4844_v46, %v4004_v49  ;;  %v4031_v23 = vadd.f32 %v4924_v33, %v1543_v62  ;;  %v4927_v0 = vld [vmem:[#allocation25_spill] sm:$0xff]  ;;  %v4930_v62 = vld [vmem:[#allocation27_spill] sm:$0xff] }
 0x1dd   : > { %v4034_v54 = vadd.f32 %v4925_v55, %v1219_v6  ;;  %v1443_v30 = vadd.f32 %v4926_v5, %v1377_v8  ;;  %v4039_v43 = vsel %vm1054_vm8, %v1120_v40, 0.0  ;;  %1716 = vrot.lane.b32.xlu1 %v1498_v38, %s2332_s6  ;;  %v1439_v24 = vadd.f32 %v4927_v0, %v3799_v59  ;;  %v4928_v9 = vld [vmem:[#allocation89_spill] sm:$0xff]  ;;  %v4931_v6 = vld [vmem:[#allocation102_spill] sm:$0xff]  ;;  %v4932_v55 = vld [vmem:[#allocation15_spill] sm:$0xff]  ;;  %v967_v40 = vpop.permute.xlu1 %966 }
 0x1de   : > { %4923 = vst [vmem:[#allocation54_spill] sm:$0xff] %v4024_v17  ;;  %v4045_v20 = vadd.f32 %v1304_v36, %v4928_v9  ;;  %v4048_v33 = vadd.f32 %v4930_v62, %v1539_v15  ;;  %v4052_v17 = vmul.f32 %v4932_v55, %v4931_v6  ;;  %v1478_v8 = vmul.f32 %v4857_v63, %v4039_v43  ;;  %v4933_v0 = vld [vmem:[#allocation50_spill] sm:$0xff]  ;;  %v4934_v62 = vld [vmem:[#allocation24_spill] sm:$0xff] }
 0x1df   : > { %v1117_v38 = vsel %vm1112_vm10, %v1097_v37, %v1103_v4  ;;  %v1209_v59 = vmul.f32 %v2604_v28, %v3900_v50  ;;  %v978_v15 = vsel %vm976_vm7, %v967_v40, %v3852_v44  ;;  %v981_v5 = vsel %vm976_vm7, %v961_v48, %v967_v40  ;;  %v4935_v37 = vld [vmem:[#allocation60_spill] sm:$0xff]  ;;  %v4082_v29 = vpop.permute.xlu0 %1098 }
 0x1e0   : > { %4929 = vst [vmem:[#allocation76_spill] sm:$0xff] %v4045_v20  ;;  %v4062_v36 = vsel %vm1055_vm14, %v1117_v38, 0.0  ;;  %v1448_v9 = vadd.f32 %v4933_v0, %v1382_v60  ;;  %v4071_v20 = vadd.f32 %v4934_v62, %v1541_v53  ;;  %v1440_v13 = vadd.f32 %v4935_v37, %v1374_v11  ;;  %v4936_v60 = vld [vmem:[#allocation28_spill] sm:$0xff]  ;;  %v4939_v62 = vld [vmem:[#allocation43_spill] sm:$0xff] }
 0x1e1   : > { %v1479_v50 = vmul.f32 %v4857_v63, %v4062_v36  ;;  %v4078_v38 = vsel %vm920_vm4, %v981_v5, 0.0  ;;  %v1039_v44 = vsel %vm921_vm6, %v978_v15, 0.0  ;;  %v1505_v21 = vadd.f32 %v1478_v8, %v1439_v24  ;;  %v4937_v11 = vld [vmem:[#allocation36_spill] sm:$0xff] }
 0x1e2   : > { %v1509_v48 = vadd.f32 %v3784_v26, %v1443_v30  ;;  %v4087_v53 = vmul.f32 %v4932_v55, %v4936_v60  ;;  %v1138_v40 = vsel %vm1112_vm10, %v3907_v56, %v4937_v11  ;;  %v1544_v5 = vmul.f32 %v4845_v14, %v4078_v38  ;;  %v4938_v30 = vld [vmem:[#allocation31_spill] sm:$0xff] }
 0x1e3   : > { %v1506_v0 = vadd.f32 %v1479_v50, %v1440_v13  ;;  %v1376_v15 = vmul.f32 %v4844_v46, %v1039_v44  ;;  %v1545_v24 = vmul.f32 %v4845_v14, %v1039_v44  ;;  %1706 = vrot.lane.b32.xlu0 %v1505_v21, %s2332_s6  ;;  %v1121_v26 = vsel %vm1112_vm10, %v3701_v22, %v4082_v29  ;;  %v4940_v50 = vld [vmem:[#allocation65_spill] sm:$0xff] }
 0x1e4   : > { %v1269_v8 = vadd.f32 %v4938_v30, %v1209_v59  ;;  %v4105_v37 = vmul.f32 %v4932_v55, %v4939_v62  ;;  %v1114_v13 = vsel %vm1112_vm10, %v1103_v4, %v3907_v56  ;;  %v4111_v11 = vadd.f32 %v4940_v50, %v1544_v5  ;;  %v4942_v59 = vld [vmem:[#allocation29_spill] sm:$0xff]  ;;  %v963_v4 = vpop.permute.xlu1 %962  ;;  %v969_v5 = vpop.permute.xlu0 %968 }
 0x1e5   : > { %v4115_v14 = vsel %vm1054_vm8, %v1121_v26, 0.0  ;;  %1712 = vrot.lane.b32.xlu1 %v1506_v0, %s2332_s6  ;;  %v1175_v22 = vsel %vm1057_vm3, %v1138_v40, 0.0  ;;  %v1375_v21 = vmul.f32 %v4844_v46, %v4078_v38  ;;  %v4123_v44 = vadd.f32 %v4942_v59, %v1545_v24  ;;  %v4944_v26 = vld [vmem:[#allocation53_spill] sm:$0xff] }
 0x1e6   : > { %4941 = vst [vmem:[#allocation77_spill] sm:$0xff] %v4111_v11  ;;  %v1487_v56 = vmul.f32 %v4883_v10, %v4115_v14  ;;  %v1210_v51 = vmul.f32 %v2604_v28, %v3948_v1  ;;  %v1305_v0 = vmul.f32 %v4858_v2, %v3979_v16  ;;  %v1139_v40 = vsel %vm1112_vm10, %v4009_v52, %v4944_v26  ;;  %v4945_v50 = vld [vmem:[#allocation57_spill] sm:$0xff] }
 0x1e7   : > { %4943 = vst [vmem:[#allocation81_spill] sm:$0xff] %v4123_v44  ;;  %v979_v46 = vsel %vm976_vm7, %v969_v5, %v3981_v39  ;;  %v1223_v24 = vmul.f32 %v4877_v47, %v3832_v45  ;;  %v1174_v30 = vsel %vm1056_vm1, %v1114_v13, 0.0  ;;  %v1442_v28 = vadd.f32 %v4945_v50, %v1376_v15  ;;  %1722 = vrot.lane.b32.xlu0 %v4000_v57, %s2332_s6  ;;  %v4946_v44 = vld [vmem:[#allocation19_spill] sm:$0xff] }
 0x1e8   : > { %v1514_v1 = vadd.f32 %v1487_v56, %v1448_v9  ;;  %v1319_v59 = vmul.f32 %v4882_v25, %v3870_v18  ;;  %v1481_v26 = vmul.f32 %v4857_v63, %v1175_v22  ;;  %v985_v39 = vsel %vm976_vm7, %v4946_v44, %v963_v4  ;;  %v4947_v9 = vld [vmem:[#allocation64_spill] sm:$0xff] }
 0x1e9   : > { %v1048_v45 = vsel %vm921_vm6, %v979_v46, 0.0  ;;  %v4155_v13 = vsel %vm1057_vm3, %v1139_v40, 0.0  ;;  %v1441_v15 = vadd.f32 %v4947_v9, %v1375_v21  ;;  %v1320_v57 = vmul.f32 %v4882_v25, %v4115_v14 }
 0x1ea   : > { %v982_v56 = vsel %vm976_vm7, %v963_v4, %v969_v5  ;;  %1708 = vrot.lane.b32.xlu1 %v1514_v1, %s2332_s6  ;;  %v1306_v44 = vmul.f32 %v4858_v2, %v3965_v27  ;;  %v1480_v50 = vmul.f32 %v4857_v63, %v1174_v30  ;;  %v4166_v46 = vadd.f32 %v1305_v0, %v1269_v8  ;;  %v4949_v4 = vld [vmem:[#allocation95_spill] sm:$0xff] }
 0x1eb   : > { %v1270_v40 = vadd.f32 %v4948_v32, %v1210_v51  ;;  %v1046_v21 = vsel %vm919_vm5, %v985_v39, 0.0  ;;  %v1385_v9 = vmul.f32 %v4863_v42, %v1048_v45  ;;  %1678 = vrot.lane.b32.xlu0 %v1509_v48, %s2332_s6  ;;  %v1508_v11 = vadd.f32 %v1481_v26, %v1442_v28  ;;  %v4951_v51 = vld [vmem:[#allocation83_spill] sm:$0xff] }
 0x1ec   : > { %v1283_v5 = vadd.f32 %v4949_v4, %v1223_v24  ;;  %v1490_v1 = vmul.f32 %v4883_v10, %v4155_v13  ;;  %v1047_v63 = vsel %vm920_vm4, %v982_v56, 0.0  ;;  %v4182_v0 = vadd.f32 %v4951_v51, %v4034_v54  ;;  %v4954_v28 = vld [vmem:[#allocation75_spill] sm:$0xff] }
 0x1ed   : > { %v4178_v8 = vadd.f32 %v1306_v44, %v1270_v40  ;;  %v4186_v39 = vmul.f32 %v4932_v55, %v4039_v43  ;;  %v1507_v48 = vadd.f32 %v1480_v50, %v1441_v15  ;;  %v4192_v26 = vadd.f32 %v1320_v57, %v4954_v28  ;;  %v4956_v40 = vld [vmem:[#allocation22_spill] sm:$0xff]  ;;  %v1620_v50 = vpop.permute.xlu1 %1619  ;;  %v4958_v28 = vld [vmem:[#allocation16_spill] sm:$0xff] }
 0x1ee   : > { %4952 = vst [vmem:[#allocation40_spill] sm:$0xff] %v4182_v0  ;;  %1724 = vrot.lane.b32.xlu1 %v1508_v11, %s2332_s6  ;;  %v4189_v24 = vadd.f32 %v1319_v59, %v1283_v5  ;;  %v4196_v56 = vmul.f32 %v4932_v55, %v4062_v36  ;;  %v4199_v44 = vmul.f32 %v4932_v55, %v1174_v30  ;;  %v4957_v59 = vld [vmem:[#allocation62_spill] sm:$0xff]  ;;  %vm1728_vm7 = vcmp.lt.s32.totalorder %v2626_v41, 64 }
 0x1ef   : > { %4950 = vst [vmem:[#allocation78_spill] sm:$0xff] %v4178_v8  ;;  %4955 = vst [vmem:[#allocation79_spill] sm:$0xff] %v4192_v26  ;;  %v1225_v54 = vmul.f32 %v4877_v47, %v1046_v21  ;;  %v1383_v32 = vmul.f32 %v4863_v42, %v1046_v21  ;;  %v1551_v4 = vmul.f32 %v4956_v40, %v1046_v21  ;;  %1718 = vrot.lane.b32.xlu0 %v1507_v48, %s2332_s6 }
 0x1f0   : > { %4953 = vst [vmem:[#allocation55_spill] sm:$0xff] %v4189_v24  ;;  %v1384_v11 = vmul.f32 %v4863_v42, %v1047_v63  ;;  %v1451_v15 = vadd.f32 %v4957_v59, %v1385_v9  ;;  %v1552_v57 = vmul.f32 %v4956_v40, %v1047_v63  ;;  %v1635_v5 = vmul.f32 %v1620_v50, %v4936_v60  ;;  %v4218_v59 = vpop.permute.xlu0 %1615  ;;  %v4959_v60 = vld [vmem:[#allocation70_spill] sm:$0xff] }
 0x1f1   : > { %v1636_v51 = vmul.f32 %v1620_v50, %v4939_v62  ;;  %v1637_v26 = vmul.f32 %v1620_v50, %v4958_v28  ;;  %v1634_v0 = vmul.f32 %v1620_v50, %v4931_v6  ;;  %v1638_v24 = vmul.f32 %v1620_v50, %v4039_v43  ;;  %v4960_v6 = vld [vmem:[#allocation23_spill] sm:$0xff]  ;;  %v4961_v43 = vld [vmem:[#allocation66_spill] sm:$0xff] }
 0x1f2   : > { %v1639_v21 = vmul.f32 %v1620_v50, %v4062_v36  ;;  %v4214_v42 = vmul.f32 %v1620_v50, %v1174_v30  ;;  %v4216_v9 = vmul.f32 %v1620_v50, %v1175_v22  ;;  %v4221_v48 = vadd.f32 %v1635_v5, %v4048_v33  ;;  %v4962_v30 = vld [vmem:[#allocation67_spill] sm:$0xff]  ;;  %v1105_v50 = vpop.permute.xlu1 %1104 }
 0x1f3   : > { %v4224_v8 = vadd.f32 %v1636_v51, %v4959_v60  ;;  %v4227_v62 = vadd.f32 %v1637_v26, %v4071_v20  ;;  %v4230_v55 = vadd.f32 %v1634_v0, %v4960_v6  ;;  %v1449_v36 = vadd.f32 %v4961_v43, %v1383_v32  ;;  %v4966_v43 = vld [vmem:[#allocation87_spill] sm:$0xff] }
 0x1f4   : > { %v4234_v28 = vadd.f32 %v4962_v30, %v1551_v4  ;;  %v4237_v22 = vmul.f32 %v4877_v47, %v1047_v63  ;;  %v4240_v33 = vmul.f32 %v4956_v40, %v1048_v45  ;;  %v1115_v20 = vsel %vm1112_vm10, %v1105_v50, %v4009_v52  ;;  %v4963_v47 = vld [vmem:[#allocation68_spill] sm:$0xff]  ;;  %v4964_v4 = vld [vmem:[#allocation69_spill] sm:$0xff] }
 0x1f5   : > { %v1118_v0 = vsel %vm1112_vm10, %v4082_v29, %v1105_v50  ;;  %v1630_v26 = vmul.f32 %v4218_v59, %v3925_v35  ;;  %v1631_v32 = vmul.f32 %v4218_v59, %v3979_v16  ;;  %v1450_v63 = vadd.f32 %v4963_v47, %v1384_v11  ;;  %v4965_v35 = vld [vmem:[#allocation21_spill] sm:$0xff] }
 0x1f6   : > { %v4254_v45 = vadd.f32 %v4964_v4, %v1552_v57  ;;  %v1182_v40 = vsel %vm1055_vm14, %v1118_v0, 0.0  ;;  %v1183_v52 = vsel %vm1056_vm1, %v1115_v20, 0.0  ;;  %v1517_v51 = vadd.f32 %v1490_v1, %v1451_v15  ;;  %v1624_v6 = vpop.permute.xlu1 %1623  ;;  %v1196_v57 = vpop.permute.xlu0 %1195  ;;  %v4967_v20 = vld [vmem:[#allocation97_spill] sm:$0xff] }
 0x1f7   : > { %v1488_v5 = vmul.f32 %v4883_v10, %v1182_v40  ;;  %v1489_v29 = vmul.f32 %v4883_v10, %v1183_v52  ;;  %v1285_v60 = vadd.f32 %v4965_v35, %v1225_v54  ;;  %v1321_v16 = vmul.f32 %v4882_v25, %v1182_v40  ;;  %v4968_v1 = vld [vmem:[#allocation73_spill] sm:$0xff] }
 0x1f8   : > { %v1322_v11 = vmul.f32 %v4882_v25, %v1183_v52  ;;  %v4266_v30 = vadd.f32 %v1630_v26, %v4966_v43  ;;  %v4269_v31 = vadd.f32 %v1631_v32, %v3921_v3  ;;  %v1212_v0 = vmul.f32 %v1196_v57, %v4967_v20  ;;  %v4969_v3 = vld [vmem:[#allocation85_spill] sm:$0xff] }
 0x1f9   : > { %v1515_v58 = vadd.f32 %v1488_v5, %v1449_v36  ;;  %v1516_v50 = vadd.f32 %v1489_v29, %v1450_v63  ;;  %v1213_v10 = vmul.f32 %v1196_v57, %v3655_v7  ;;  %v1214_v54 = vmul.f32 %v1196_v57, %v4968_v1  ;;  %v4970_v36 = vld [vmem:[#allocation86_spill] sm:$0xff]  ;;  %v4972_v5 = vld [vmem:[#allocation88_spill] sm:$0xff]  ;;  %v4975_v43 = vld [vmem:[#allocation45_spill] sm:$0xff] }
 0x1fa   : > { %v1643_v15 = vmul.f32 %v1624_v6, %v3857_v12  ;;  %v1644_v25 = vmul.f32 %v1624_v6, %v3861_v61  ;;  %v1645_v47 = vmul.f32 %v1624_v6, %v3870_v18  ;;  %v1272_v26 = vadd.f32 %v4969_v3, %v1212_v0  ;;  %v4971_v63 = vld [vmem:[#allocation74_spill] sm:$0xff]  ;;  %v4973_v29 = vld [vmem:[#allocation72_spill] sm:$0xff]  ;;  %v4976_v0 = vld [vmem:[#allocation39_spill] sm:$0xff] }
 0x1fb   : > { %1720 = vrot.lane.b32.xlu1 %v1516_v50, %s2332_s6  ;;  %1714 = vrot.lane.b32.xlu0 %v1515_v58, %s2332_s6  ;;  %v1273_v32 = vadd.f32 %v4970_v36, %v1213_v10  ;;  %v1211_v4 = vmul.f32 %v1196_v57, %v4971_v63  ;;  %v1803_v7 = vld [vmem:[%s4645_s4 + $0x10] sm:$0xff]  ;;  %v1274_v12 = vadd.f32 %v4972_v5, %v1214_v54  ;;  %v4974_v18 = vld [vmem:[#allocation84_spill] sm:$0xff] }
 0x1fc   : > { %v4287_v61 = vadd.f32 %v1643_v15, %v4973_v29  ;;  %v4290_v35 = vadd.f32 %v1644_v25, %v4974_v18  ;;  %v4293_v58 = vadd.f32 %v1645_v47, %v4975_v43  ;;  %v4296_v50 = vadd.f32 %v4052_v17, %v1272_v26  ;;  %v4977_v25 = vld [vmem:[#allocation48_spill] sm:$0xff]  ;;  %v4978_v47 = vld [vmem:[#allocation49_spill] sm:$0xff]  ;;  %v4979_v17 = vld [vmem:[#allocation71_spill] sm:$0xff] }
 0x1fd   : > { %v4299_v20 = vadd.f32 %v4087_v53, %v1273_v32  ;;  %v1271_v10 = vadd.f32 %v4976_v0, %v1211_v4  ;;  %v1632_v1 = vmul.f32 %v4218_v59, %v3965_v27  ;;  %v4305_v54 = vadd.f32 %v4105_v37, %v1274_v12  ;;  %v4980_v37 = vld [vmem:[#allocation90_spill] sm:$0xff]  ;;  %v4981_v32 = vld [vmem:[#allocation32_spill] sm:$0xff] }
 0x1fe   : > { %v1215_v15 = vmul.f32 %v1196_v57, %v3714_v19  ;;  %v4309_v3 = vadd.f32 %v1638_v24, %v4977_v25  ;;  %v1216_v36 = vmul.f32 %v1196_v57, %v4978_v47  ;;  %v4320_v27 = vadd.f32 %v1639_v21, %v4031_v23  ;;  %v1802_v19 = vld [vmem:[%s4645_s4 + $0x8] sm:$0xff]  ;;  %v4982_v4 = vld [vmem:[#allocation34_spill] sm:$0xff] }
 0x1ff   : > { %1816 = vperm.xlu1 %2167, %v1803_v7   ;;  %1726 = vrot.lane.b32.xlu0 %v1517_v51, %s2332_s6  ;;  %v4314_v53 = vadd.f32 %v4979_v17, %v1271_v10  ;;  %v4317_v26 = vadd.f32 %v1632_v1, %v3975_v34  ;;  %v1633_v51 = vmul.f32 %v4218_v59, %v4982_v4  ;;  %v4983_v5 = vld [vmem:[#allocation14_spill] sm:$0xff]  ;;  %v4984_v21 = vld [vmem:[#allocation77_spill] sm:$0xff] }
 0x200   : > { %v4326_v24 = vadd.f32 %v4980_v37, %v1215_v15  ;;  %v1276_v63 = vadd.f32 %v4981_v32, %v1216_v36  ;;  %v1646_v7 = vmul.f32 %v1624_v6, %v4115_v14  ;;  %v1642_v34 = vmul.f32 %v1624_v6, %v4983_v5  ;;  %v4985_v43 = vld [vmem:[#allocation38_spill] sm:$0xff]  ;;  %v4987_v14 = vld [vmem:[#allocation101_spill] sm:$0xff] }
 0x201   : > { %v1217_v12 = vmul.f32 %v1196_v57, %v4004_v49  ;;  %v1218_v23 = vmul.f32 %v1196_v57, %v4078_v38  ;;  %v4337_v29 = vadd.f32 %v4214_v42, %v4984_v21  ;;  %v4343_v0 = vadd.f32 %v1633_v51, %v4985_v43  ;;  %v4986_v10 = vld [vmem:[#allocation18_spill] sm:$0xff]  ;;  %v4989_v38 = vld [vmem:[#allocation96_spill] sm:$0xff]  ;;  %v4990_v42 = vld [vmem:[#allocation17_spill] sm:$0xff] }
 0x202   : > { %v4340_v18 = vadd.f32 %v4186_v39, %v1276_v63  ;;  %v4346_v1 = vadd.f32 %v1646_v7, %v4986_v10  ;;  %v1286_v15 = vadd.f32 %v4987_v14, %v4237_v22  ;;  %v4988_v49 = vld [vmem:[#allocation82_spill] sm:$0xff]  ;;  %v4991_v36 = vld [vmem:[#allocation81_spill] sm:$0xff]  ;;  %v4359_v17 = vadd.f32 %v1321_v16, %v1285_v60  ;;  %v4992_v22 = vld [vmem:[#allocation63_spill] sm:$0xff]  ;;  %v4380_v60 = vpop.permute.xlu1 %1806 }
 0x203   : > { %1811 = vperm.xlu0 %2165, %v1802_v19   ;;  %v4351_v25 = vadd.f32 %v1642_v34, %v4988_v49  ;;  %v1277_v57 = vadd.f32 %v4989_v38, %v1217_v12  ;;  %v1278_v47 = vadd.f32 %v4990_v42, %v1218_v23  ;;  %v4357_v39 = vadd.f32 %v4216_v9, %v4991_v36  ;;  %v4994_v16 = vld [vmem:[#allocation98_spill] sm:$0xff]  ;;  %v4997_v12 = vld [vmem:[#allocation93_spill] sm:$0xff]  ;;  %v4998_v14 = vld [vmem:[#allocation91_spill] sm:$0xff] }
 0x204   : > { %v1647_v37 = vmul.f32 %v1624_v6, %v1182_v40  ;;  %v1648_v32 = vmul.f32 %v1624_v6, %v1183_v52  ;;  %v4361_v63 = vadd.f32 %v1322_v11, %v1286_v15  ;;  %v1613_v19 = vadd.f32 %v4992_v22, %v4240_v33  ;;  %v4993_v33 = vld [vmem:[#allocation92_spill] sm:$0xff] }
 0x205   : > { %v4366_v4 = vadd.f32 %v4196_v56, %v1277_v57  ;;  %v4369_v51 = vadd.f32 %v4199_v44, %v1278_v47  ;;  %v1649_v7 = vmul.f32 %v1624_v6, %v4155_v13  ;;  %v1300_v56 = vmul.f32 %v4858_v2, %v4993_v33  ;;  %v4996_v6 = vld [vmem:[#allocation47_spill] sm:$0xff]  ;;  %v4999_v38 = vld [vmem:[#allocation44_spill] sm:$0xff] }
 0x206   : > { %v4373_v9 = vadd.f32 %v1647_v37, %v4234_v28  ;;  %v4376_v40 = vadd.f32 %v1648_v32, %v4254_v45  ;;  %v1301_v44 = vmul.f32 %v4858_v2, %v4994_v16  ;;  %v1627_v13 = vmul.f32 %v4218_v59, %v4994_v16  ;;  %v4995_v28 = vld [vmem:[#allocation99_spill] sm:$0xff] }
 0x207   : > { %v4378_v52 = vadd.f32 %v1649_v7, %v1613_v19  ;;  %v1628_v45 = vmul.f32 %v4218_v59, %v4995_v28  ;;  %v1324_v5 = vadd.f32 %v1300_v56, %v4996_v6  ;;  %v1302_v22 = vmul.f32 %v4858_v2, %v4995_v28  ;;  %v5000_v7 = vld [vmem:[#allocation30_spill] sm:$0xff]  ;;  %v5001_v16 = vld [vmem:[#allocation35_spill] sm:$0xff]  ;;  %v5002_v6 = vld [vmem:[#allocation33_spill] sm:$0xff] }
 0x208   : > { %v1325_v23 = vadd.f32 %v1301_v44, %v4997_v12  ;;  %v1651_v15 = vadd.f32 %v1627_v13, %v4998_v14  ;;  %v1629_v56 = vmul.f32 %v4218_v59, %v5000_v7 }
 0x209   : > { %v1652_v57 = vadd.f32 %v1628_v45, %v4999_v38  ;;  %v1326_v44 = vadd.f32 %v1302_v22, %v5001_v16  ;;  %v5004_v22 = vld [vmem:[#allocation26_spill] sm:$0xff] }
 0x217   : > { %v1681_v11 = vpop.permute.xlu1 %1680 }
 0x221   : > { %v1687_v34 = vpop.permute.xlu0 %1686 }
 0x222   : > { %v1693_v21 = vpop.permute.xlu1 %1692  ;;  %v1747_v43 = vsel %vm1728_vm7, %v1681_v11, %v1687_v34 }
 0x223   : > { %v1744_v10 = vsel %vm1728_vm7, %v1687_v34, %v1693_v21  ;;  %v1754_v49 = vadd.f32 %v1747_v43, %v1324_v5  ;;  %v1653_v5 = vadd.f32 %v1629_v56, %v5002_v6 }
 0x224   : > { %v1755_v42 = vadd.f32 %v1744_v10, %v1325_v23 }
 0x225   : > { %v1778_v47 = vadd.f32 %v1754_v49, %v1651_v15 }
 0x226   : > { %v1779_v36 = vadd.f32 %v1755_v42, %v1652_v57 }
 0x227   : > { %v1820_v37 = vadd.f32 %v4380_v60, %v1778_v47 }
 0x228   : > { %v1821_v32 = vadd.f32 %v4380_v60, %v1779_v36 }
 0x229   : > { %v1683_v19 = vpop.permute.xlu0 %1682  ;;  %1844 = vst [vmem:[%s4406_s10 + $0x8] sm:$0xff] %v1820_v37 }
 0x22a   : > { %1845 = vst [vmem:[%s4406_s10 + $0x10] sm:$0xff] %v1821_v32  ;;  %v5003_v32 = vld [vmem:[#allocation46_spill] sm:$0xff] }
 0x22d   : > { %v1699_v13 = vpop.permute.xlu0 %1698 }
 0x22e   : > { %v1741_v45 = vsel %vm1728_vm7, %v1693_v21, %v1699_v13 }
 0x22f   : > { %v1756_v28 = vadd.f32 %v1741_v45, %v1326_v44  ;;  %v1303_v44 = vmul.f32 %v4858_v2, %v5000_v7 }
 0x231   : > { %v1780_v34 = vadd.f32 %v1756_v28, %v1653_v5  ;;  %v5006_v5 = vld [vmem:[#allocation37_spill] sm:$0xff] }
 0x232   : > { %v1689_v12 = vpop.permute.xlu1 %1688 }
 0x233   : > { %v1695_v23 = vpop.permute.xlu0 %1694  ;;  %v1748_v43 = vsel %vm1728_vm7, %v1683_v19, %v1689_v12  ;;  %v1822_v10 = vadd.f32 %v4380_v60, %v1780_v34  ;;  %v5007_v34 = vld [vmem:[#allocation100_spill] sm:$0xff] }
 0x234   : > { %v1745_v14 = vsel %vm1728_vm7, %v1689_v12, %v1695_v23  ;;  %v1762_v15 = vadd.f32 %v1748_v43, %v4296_v50  ;;  %v1626_v50 = vmul.f32 %v4218_v59, %v4993_v33  ;;  %v1327_v12 = vadd.f32 %v1303_v44, %v5007_v34  ;;  %v5011_v44 = vld [vmem:[#allocation15_spill] sm:$0xff] }
 0x235   : > { %v1763_v49 = vadd.f32 %v1745_v14, %v4299_v20  ;;  %1846 = vst [vmem:[%s4406_s10 + $0x18] sm:$0xff] %v1822_v10 }
 0x236   : > { %v4425_v21 = vadd.f32 %v1762_v15, %v4221_v48  ;;  %v4427_v38 = vpop.permute.xlu1 %1684 }
 0x237   : > { %v4430_v57 = vadd.f32 %v1763_v49, %v4224_v8  ;;  %v1650_v8 = vadd.f32 %v1626_v50, %v5003_v32  ;;  %v5008_v49 = vld [vmem:[#allocation54_spill] sm:$0xff] }
 0x23a   : > { %v1701_v42 = vpop.permute.xlu1 %1700 }
 0x23b   : > { %v1742_v47 = vsel %vm1728_vm7, %v1695_v23, %v1701_v42 }
 0x23c   : > { %v1764_v36 = vadd.f32 %v1742_v47, %v4305_v54 }
 0x23e   : > { %v4436_v37 = vadd.f32 %v1764_v36, %v4227_v62 }
 0x241   : > { %v1675_v20 = vpop.permute.xlu0 %1674 }
 0x242   : > { %v1750_v48 = vsel %vm1728_vm7, %v1675_v20, %v1681_v11  ;;  %v1697_v16 = vpop.permute.xlu1 %1696  ;;  %v5005_v11 = vld [vmem:[#allocation20_spill] sm:$0xff] }
 0x243   : > { %v1753_v56 = vadd.f32 %v1750_v48, %v5004_v22 }
 0x245   : > { %v1777_v54 = vadd.f32 %v1753_v56, %v1650_v8  ;;  %v1691_v45 = vpop.permute.xlu0 %1690  ;;  %v5009_v8 = vld [vmem:[#allocation76_spill] sm:$0xff] }
 0x246   : > { %v1746_v62 = vsel %vm1728_vm7, %v1691_v45, %v1697_v16  ;;  %v1749_v59 = vsel %vm1728_vm7, %v4427_v38, %v1691_v45 }
 0x247   : > { %v1819_v33 = vadd.f32 %v4380_v60, %v1777_v54  ;;  %v1770_v6 = vadd.f32 %v1749_v59, %v5005_v11  ;;  %v1771_v28 = vadd.f32 %v1746_v62, %v5006_v5  ;;  %v1705_v23 = vpop.permute.xlu1 %1704 }
 0x248   : > { %v1738_v2 = vsel %vm1728_vm7, %v1699_v13, %v1705_v23 }
 0x249   : > { %1843 = vst [vmem:[%s4406_s10] sm:$0xff] %v1819_v33  ;;  %v4459_v7 = vadd.f32 %v1770_v6, %v4287_v61  ;;  %v4462_v43 = vadd.f32 %v1771_v28, %v4290_v35  ;;  %v1703_v10 = vpop.permute.xlu0 %1702  ;;  %v1757_v14 = vadd.f32 %v1738_v2, %v1327_v12 }
 0x24a   : > { %v1743_v15 = vsel %vm1728_vm7, %v1697_v16, %v1703_v10 }
 0x24b   : > { %v1772_v47 = vadd.f32 %v1743_v15, %v5008_v49  ;;  %v1781_v36 = vadd.f32 %v1757_v14, %v4266_v30  ;;  %v1677_v50 = vpop.permute.xlu1 %1676 }
 0x24c   : > { %v1751_v13 = vsel %vm1728_vm7, %v1677_v50, %v1683_v19 }
 0x24d   : > { %v4471_v61 = vadd.f32 %v1772_v47, %v4293_v58  ;;  %v1823_v35 = vadd.f32 %v4380_v60, %v1781_v36  ;;  %v1761_v20 = vadd.f32 %v1751_v13, %v4314_v53  ;;  %v5010_v53 = vld [vmem:[#allocation16_spill] sm:$0xff] }
 0x24e   : > { %v1711_v48 = vpop.permute.xlu0 %1710  ;;  %v1311_v54 = vmul.f32 %v5011_v44, %v5010_v53  ;;  %v5014_v36 = vld [vmem:[#allocation40_spill] sm:$0xff] }
 0x24f   : > { %v1735_v32 = vsel %vm1728_vm7, %v1705_v23, %v1711_v48  ;;  %1847 = vst [vmem:[%s4406_s10 + $0x20] sm:$0xff] %v1823_v35  ;;  %v4479_v30 = vadd.f32 %v1761_v20, %v4230_v55  ;;  %v1717_v19 = vpop.permute.xlu1 %1716 }
 0x250   : > { %v1758_v22 = vadd.f32 %v1735_v32, %v5009_v8  ;;  %v1732_v58 = vsel %vm1728_vm7, %v1711_v48, %v1717_v19  ;;  %v1335_v59 = vadd.f32 %v1311_v54, %v4326_v24 }
 0x251   : > { %v1759_v16 = vadd.f32 %v1732_v58, %v4166_v46 }
 0x252   : > { %v1782_v56 = vadd.f32 %v1758_v22, %v4269_v31 }
 0x253   : > { %v1783_v62 = vadd.f32 %v1759_v16, %v4317_v26 }
 0x254   : > { %v1824_v45 = vadd.f32 %v4380_v60, %v1782_v56 }
 0x255   : > { %v1825_v55 = vadd.f32 %v4380_v60, %v1783_v62  ;;  %v1707_v33 = vpop.permute.xlu0 %1706 }
 0x256   : > { %1848 = vst [vmem:[%s4406_s10 + $0x28] sm:$0xff] %v1824_v45  ;;  %v1739_v11 = vsel %vm1728_vm7, %v1701_v42, %v1707_v33  ;;  %v5012_v42 = vld [vmem:[#allocation78_spill] sm:$0xff] }
 0x257   : > { %v1713_v6 = vpop.permute.xlu1 %1712  ;;  %1849 = vst [vmem:[%s4406_s10 + $0x30] sm:$0xff] %v1825_v55  ;;  %v1765_v31 = vadd.f32 %v1739_v11, %v1335_v59 }
 0x258   : > { %v1736_v46 = vsel %vm1728_vm7, %v1707_v33, %v1713_v6 }
 0x259   : > { %v1766_v5 = vadd.f32 %v1736_v46, %v4340_v18  ;;  %v4500_v26 = vadd.f32 %v1765_v31, %v4309_v3  ;;  %v1723_v28 = vpop.permute.xlu0 %1722  ;;  %v5013_v18 = vld [vmem:[#allocation55_spill] sm:$0xff] }
 0x25a   : > { %v1729_v24 = vsel %vm1728_vm7, %v1717_v19, %v1723_v28  ;;  %v5015_v19 = vld [vmem:[#allocation79_spill] sm:$0xff] }
 0x25b   : > { %v4503_v34 = vadd.f32 %v1766_v5, %v4320_v27  ;;  %v1760_v12 = vadd.f32 %v1729_v24, %v5012_v42 }
 0x25c   : > { %v1709_v23 = vpop.permute.xlu1 %1708 }
 0x25d   : > { %v1740_v2 = vsel %vm1728_vm7, %v1703_v10, %v1709_v23  ;;  %v1784_v14 = vadd.f32 %v1760_v12, %v4343_v0  ;;  %v1679_v49 = vpop.permute.xlu0 %1678 }
 0x25e   : > { %v1773_v15 = vadd.f32 %v1740_v2, %v5013_v18  ;;  %v1752_v3 = vsel %vm1728_vm7, %v1679_v49, %v4427_v38 }
 0x25f   : > { %v1826_v27 = vadd.f32 %v4380_v60, %v1784_v14  ;;  %v1769_v50 = vadd.f32 %v1752_v3, %v5014_v36 }
 0x260   : > { %v1797_v47 = vadd.f32 %v1773_v15, %v4346_v1  ;;  %v1725_v13 = vpop.permute.xlu1 %1724 }
 0x261   : > { %1850 = vst [vmem:[%s4406_s10 + $0x38] sm:$0xff] %v1826_v27  ;;  %v1793_v35 = vadd.f32 %v1769_v50, %v4351_v25  ;;  %v1719_v10 = vpop.permute.xlu0 %1718 }
 0x262   : > { %v1730_v0 = vsel %vm1728_vm7, %v1719_v10, %v1725_v13  ;;  %v1733_v20 = vsel %vm1728_vm7, %v1713_v6, %v1719_v10 }
 0x263   : > { %v1767_v48 = vadd.f32 %v1733_v20, %v4366_v4  ;;  %v1768_v60 = vadd.f32 %v1730_v0, %v4369_v51 }
 0x265   : > { %v1791_v1 = vadd.f32 %v1767_v48, %v4337_v29  ;;  %v1792_v38 = vadd.f32 %v1768_v60, %v4357_v39 }
 0x26d   : > { %v1721_v32 = vpop.permute.xlu1 %1720  ;;  %v1715_v8 = vpop.permute.xlu0 %1714 }
 0x26e   : > { %v1734_v25 = vsel %vm1728_vm7, %v1715_v8, %v1721_v32  ;;  %v1737_v22 = vsel %vm1728_vm7, %v1709_v23, %v1715_v8 }
 0x26f   : > { %v1774_v58 = vadd.f32 %v1737_v22, %v5015_v19  ;;  %v1775_v4 = vadd.f32 %v1734_v25, %v4359_v17 }
 0x271   : > { %v1798_v56 = vadd.f32 %v1774_v58, %v4373_v9  ;;  %v1799_v51 = vadd.f32 %v1775_v4, %v4376_v40  ;;  %v1727_v16 = vpop.permute.xlu0 %1726 }
 0x272   : > { %v1731_v29 = vsel %vm1728_vm7, %v1721_v32, %v1727_v16 }
 0x273   : > { %v1776_v39 = vadd.f32 %v1731_v29, %v4361_v63 }
 0x275   : > { %v1800_v53 = vadd.f32 %v1776_v39, %v4378_v52 }
 0x27a   : > { %v1817_v17 = vpop.permute.xlu1 %1816 }
 0x27b   : > { %v1835_v9 = vadd.f32 %v1817_v17, %v1793_v35  ;;  %v1836_v41 = vadd.f32 %v1817_v17, %v4459_v7  ;;  %v1837_v63 = vadd.f32 %v1817_v17, %v4462_v43  ;;  %v1838_v40 = vadd.f32 %v1817_v17, %v4471_v61 }
 0x27c   : > { %v1839_v52 = vadd.f32 %v1817_v17, %v1797_v47  ;;  %v1840_v44 = vadd.f32 %v1817_v17, %v1798_v56  ;;  %v1841_v54 = vadd.f32 %v1817_v17, %v1799_v51  ;;  %v1842_v45 = vadd.f32 %v1817_v17, %v1800_v53 }
 0x27d   : > { %1859 = vst [vmem:[%s4406_s10 + $0x80] sm:$0xff] %v1835_v9  ;;  %1860 = vst [vmem:[%s4406_s10 + $0x88] sm:$0xff] %v1836_v41 }
 0x27e   : > { %1861 = vst [vmem:[%s4406_s10 + $0x90] sm:$0xff] %v1837_v63  ;;  %1862 = vst [vmem:[%s4406_s10 + $0x98] sm:$0xff] %v1838_v40  ;;  %v1812_v7 = vpop.permute.xlu0 %1811 }
 0x27f   : > { %1863 = vst [vmem:[%s4406_s10 + $0xa0] sm:$0xff] %v1839_v52  ;;  %1864 = vst [vmem:[%s4406_s10 + $0xa8] sm:$0xff] %v1840_v44  ;;  %v1827_v43 = vadd.f32 %v1812_v7, %v4479_v30  ;;  %v1828_v61 = vadd.f32 %v1812_v7, %v4425_v21  ;;  %v1829_v62 = vadd.f32 %v1812_v7, %v4430_v57 }
 0x280   : > { %1865 = vst [vmem:[%s4406_s10 + $0xb0] sm:$0xff] %v1841_v54  ;;  %1866 = vst [vmem:[%s4406_s10 + $0xb8] sm:$0xff] %v1842_v45  ;;  %v1830_v55 = vadd.f32 %v1812_v7, %v4436_v37  ;;  %v1831_v59 = vadd.f32 %v1812_v7, %v4500_v26  ;;  %v1832_v33 = vadd.f32 %v1812_v7, %v4503_v34 }
 0x281   : > { %v1833_v11 = vadd.f32 %v1812_v7, %v1791_v1  ;;  %v1834_v30 = vadd.f32 %v1812_v7, %v1792_v38  ;;  %1851 = vst [vmem:[%s4406_s10 + $0x40] sm:$0xff] %v1827_v43  ;;  %1852 = vst [vmem:[%s4406_s10 + $0x48] sm:$0xff] %v1828_v61 }
 0x282   : > { %1853 = vst [vmem:[%s4406_s10 + $0x50] sm:$0xff] %v1829_v62  ;;  %1854 = vst [vmem:[%s4406_s10 + $0x58] sm:$0xff] %v1830_v55 }
 0x283   : > { %1855 = vst [vmem:[%s4406_s10 + $0x60] sm:$0xff] %v1831_v59  ;;  %1856 = vst [vmem:[%s4406_s10 + $0x68] sm:$0xff] %v1832_v33 }
 0x284   : > { %1857 = vst [vmem:[%s4406_s10 + $0x70] sm:$0xff] %v1833_v11  ;;  %1858 = vst [vmem:[%s4406_s10 + $0x78] sm:$0xff] %v1834_v30 }
 0x285   : > { %2209 = shalt.err (!%p2206_p9)
}
 0x286   : > { %s2210_s27 = scalar_lea.hbm %s4568_s14, 3072  ;;  %s2214_s11 = scalar_lea.hbm %s4646_s5, 24576 }
 0x287   : > { %p2211_p10 = scmp.ne.s32.totalorder %s4568_s14, %s2210_s27  ;;  %p2215_p13 = scmp.lt.s32.totalorder %s4568_s14, %s4646_s5 }
 0x288   : > { %p2216_p0 = scmp.lt.s32.totalorder %s2214_s11, %s2210_s27 }
 0x289   : > { %p2212_p3 = pnand %p2211_p10, %p2448_p12 }
 0x28a   : > { %p2217_p1 = por %p2216_p0, %p2215_p13 }
 0x28b   : > { %p2213_p11 = pneg %p2212_p3 }
 0x28d   : > { %p2218_p7 = pnand %p2217_p1, %p2213_p11 }
 0x28f   : > { %2221 = shalt.err (!%p2218_p7)
}
 0x290   : > { %s2334_s25 = smov 1024   ;;  %s2335_s23 = smov 4096  }
 0x291   : > { %2032 = dma.vmem_to_hbm [thread:$0]  (%p2448_p12), %s4561_s24, 3072, %s4568_s14, %s4580_s9, %s2334_s25, %s2335_s23, %s2332_s6  }
 0x292 PF: > { %p2043_p2 = scmp.ge.s32.totalorder %s2316_s28, 2  ;;  %s1898_s30 = sand.u32 1, %s2276_s18  }
 0x293   : > { %p5016_p4 = scmp.ne.s32.totalorder %s4717_s21, 0  ;;  %s1899_s7 = scalar_lea.sflag [#allocation4], %s1898_s30 }
 0x295   : > { %p2039_p5 = pnand %p2043_p2, %p5016_p4 }
 0x297   : > { %p2040_p6 = pneg %p2039_p5 }
 0x299   : > { %2271 = dma.done.wait (%p2040_p6), %s1899_s7, 3072  }
 0x29a   : > { %2273 = vsyncadd (%p2040_p6), %s1899_s7, 4294964224  ;;  %s21_s28 = sadd.s32 1, %s2316_s28   ;;  %s5017_s15 = sld [smem:[#allocation8_spill]] }
 0x29b   : > { %p18_p8 = scmp.ge.s32.totalorder %s21_s28, 10   ;;  %s5018_s23 = sld [smem:[#allocation13_spill]] }
 0x29c   : > { %s5019_s24 = sld [smem:[#allocation9_spill]]  ;;  %s5023_s18 = smov %s2280_s19 }
 0x29d   : > { %s5020_s25 = sld [smem:[#allocation10_spill]]  ;;  %s5024_s19 = smov %s2284_s20 }
 0x29e   : > { %s5021_s26 = sld [smem:[#allocation11_spill]]  ;;  %s5025_s20 = smov %s2456_s17 }
 0x29f   : > { %s5022_s27 = sld [smem:[#allocation12_spill]]  ;;  %s5026_s21 = smov %s2292_s22 }
 0x2a0   : > { %s5027_s22 = smov %s5017_s15  ;;  %20 = sbr.rel (!%p18_p8) target bundleno = 9 (0x9), region = 86 }
 0x2a5   :  { %1904 = vsyncpa [#allocation3], 1 }
 0x2a6   :  { %1906 = vsyncpa [#allocation3 + $0x1], 1 }
 0x2a7   :  { %1907 = vsyncpa [#allocation4], 1 }
 0x2a8   :  { %1909 = vsyncpa [#allocation4 + $0x1], 1 }

</bundles_post_ra>
